<compile_context>
chip_gen: v5e
topology: v5e:2x2
jax: 0.10.0
libtpu: 0.0.40
codegen_flags: <defaults>
</compile_context>

<pallas_src>
import functools
import math

import jax
import jax.numpy as jnp
from jax.experimental import pallas as pl
from jax.experimental.pallas import tpu as pltpu

_TM_MAX = 512  # row tile for the projection matmuls (>=512 ~ 85% HBM roofline)


def _pick_tm(m):
    return m if m <= _TM_MAX else _TM_MAX


# ---------------------------------------------------------------------------
# Kernel 1: fused Q/K/V projection   q = xq@WqT+bq, k = xk@WkT+bk, v = xv@WvT+bv
# Tiled over the M (=L*N) rows; grid axis is "parallel" so the compiler can
# double-buffer the HBM->VMEM DMAs and shard tiles across TensorCores.
# ---------------------------------------------------------------------------
def _qkv_proj_kernel(xq_ref, xk_ref, xv_ref,
                     wqt_ref, wkt_ref, wvt_ref,
                     bq_ref, bk_ref, bv_ref,
                     q_ref, k_ref, v_ref):
    q_ref[...] = (jnp.dot(xq_ref[...], wqt_ref[...],
                          preferred_element_type=jnp.float32)
                  + bq_ref[...]).astype(q_ref.dtype)
    k_ref[...] = (jnp.dot(xk_ref[...], wkt_ref[...],
                          preferred_element_type=jnp.float32)
                  + bk_ref[...]).astype(k_ref.dtype)
    v_ref[...] = (jnp.dot(xv_ref[...], wvt_ref[...],
                          preferred_element_type=jnp.float32)
                  + bv_ref[...]).astype(v_ref.dtype)


def qkv_proj(xq, xk, xv, wqt, wkt, wvt, bq, bk, bv, *, out_dtype):
    M, Ein = xq.shape
    Eout = wqt.shape[1]
    tm = _pick_tm(M)
    x_spec = pl.BlockSpec((tm, Ein), lambda i: (i, 0))
    w_spec = pl.BlockSpec((Ein, Eout), lambda i: (0, 0))
    b_spec = pl.BlockSpec((1, Eout), lambda i: (0, 0))
    o_spec = pl.BlockSpec((tm, Eout), lambda i: (i, 0))
    out_sds = jax.ShapeDtypeStruct((M, Eout), out_dtype)
    return pl.pallas_call(
        _qkv_proj_kernel,
        out_shape=(out_sds, out_sds, out_sds),
        grid=(pl.cdiv(M, tm),),
        in_specs=[x_spec, x_spec, x_spec,
                  w_spec, w_spec, w_spec,
                  b_spec, b_spec, b_spec],
        out_specs=(o_spec, o_spec, o_spec),
        compiler_params=pltpu.CompilerParams(
            dimension_semantics=("parallel",)),
    )(xq, xk, xv, wqt, wkt, wvt, bq, bk, bv)


# ---------------------------------------------------------------------------
# Kernel 2: output projection  y = x @ WoT + bo  (row-tiled, parallel)
# ---------------------------------------------------------------------------
def _linear_kernel(x_ref, wt_ref, b_ref, o_ref):
    o_ref[...] = (jnp.dot(x_ref[...], wt_ref[...],
                          preferred_element_type=jnp.float32)
                  + b_ref[...]).astype(o_ref.dtype)


def linear_proj(x2d, wt, b2, *, out_dtype=jnp.float32):
    M, Ein = x2d.shape
    Eout = wt.shape[1]
    tm = _pick_tm(M)
    return pl.pallas_call(
        _linear_kernel,
        out_shape=jax.ShapeDtypeStruct((M, Eout), out_dtype),
        grid=(pl.cdiv(M, tm),),
        in_specs=[pl.BlockSpec((tm, Ein), lambda i: (i, 0)),
                  pl.BlockSpec((Ein, Eout), lambda i: (0, 0)),
                  pl.BlockSpec((1, Eout), lambda i: (0, 0))],
        out_specs=pl.BlockSpec((tm, Eout), lambda i: (i, 0)),
        compiler_params=pltpu.CompilerParams(
            dimension_semantics=("parallel",)),
    )(x2d, wt, b2)


# ---------------------------------------------------------------------------
# Kernel 3: attention.  Heads are sliced straight out of the (L, N, E)
# projected tensors by the BlockSpec index_map (block = (L, <batch squeezed>,
# heads_per_block*D)); all heads of the block are processed in ONE grid step
# and the merged-head output is written back lane-dense into (L, N, E).
# attn_weights are emitted in (H, N, L, L) layout (== torch's h*N+n ordering
# after a free reshape).
# ---------------------------------------------------------------------------
def _attn_kernel(q_ref, k_ref, v_ref, o_ref, w_ref=None, *,
                 heads, head_dim, scale):
    # q_ref/k_ref/v_ref/o_ref : (L, heads*head_dim)   (batch axis squeezed)
    # w_ref                   : (heads, L, L)
    q = q_ref[...] * scale          # fold 1/sqrt(D) into Q: O(L*E) muls
    k = k_ref[...]
    v = v_ref[...]
    outs = []
    for h in range(heads):          # all heads of this block in one grid step
        lo = h * head_dim
        qh = q[:, lo:lo + head_dim]
        kh = k[:, lo:lo + head_dim]
        vh = v[:, lo:lo + head_dim]
        # contract on the last axes of both -> no explicit K transpose formed
        s = jax.lax.dot_general(qh, kh, (((1,), (1,)), ((), ())),
                                preferred_element_type=jnp.float32)
        m = jnp.max(s, axis=-1, keepdims=True)
        e = jnp.exp(s - m)
        denom = jnp.sum(e, axis=-1, keepdims=True)
        # exact reciprocal keeps attn_weights within the 1e-5 tolerance;
        # approx=True would push the divide onto the otherwise-idle EUP.
        w = e * pl.reciprocal(denom, approx=False)
        if w_ref is not None:
            w_ref[h] = w.astype(w_ref.dtype)
        outs.append(jnp.dot(w.astype(vh.dtype), vh,
                            preferred_element_type=jnp.float32))
    # single lane-dense store of the merged heads
    o_ref[...] = jnp.concatenate(outs, axis=-1).astype(o_ref.dtype)


def attention_core(q3, k3, v3, num_heads, head_dim, *,
                   heads_per_block=None, return_weights=True):
    L, N, E = q3.shape
    if heads_per_block is None:
        heads_per_block = num_heads          # batch all heads per grid step
    assert num_heads % heads_per_block == 0
    eb = heads_per_block * head_dim
    assert eb == E or eb % 128 == 0, "head block must keep the lane dim aligned"
    h_blocks = num_heads // heads_per_block

    kernel = functools.partial(_attn_kernel, heads=heads_per_block,
                               head_dim=head_dim,
                               scale=1.0 / math.sqrt(head_dim))
    qkv_spec = pl.BlockSpec((L, None, eb), lambda n, h: (0, n, h))
    o_spec = pl.BlockSpec((L, None, eb), lambda n, h: (0, n, h))
    w_spec = pl.BlockSpec((heads_per_block, None, L, L),
                          lambda n, h: (h, n, 0, 0))

    if return_weights:
        out_shape = (jax.ShapeDtypeStruct((L, N, E), jnp.float32),
                     jax.ShapeDtypeStruct((num_heads, N, L, L), jnp.float32))
        out_specs = (o_spec, w_spec)
    else:
        out_shape = jax.ShapeDtypeStruct((L, N, E), jnp.float32)
        out_specs = o_spec

    res = pl.pallas_call(
        kernel,
        out_shape=out_shape,
        grid=(N, h_blocks),
        in_specs=[qkv_spec, qkv_spec, qkv_spec],
        out_specs=out_specs,
        compiler_params=pltpu.CompilerParams(
            dimension_semantics=("parallel", "parallel")),
    )(q3, k3, v3)
    if return_weights:
        return res
    return res, None


# ---------------------------------------------------------------------------
# Parameter prep (hoisted out of the forward: weight transposes / bias reshape
# happen ONCE, not per call).  compute_dtype=jnp.bfloat16 halves MXU-operand
# HBM traffic on v6e/v7x; accumulation stays f32.
# ---------------------------------------------------------------------------
def prepare_params(params, compute_dtype=jnp.float32):
    W_Q, W_K, W_V, b_Q, b_K, b_V, W_O, b_O = params
    t = lambda w: jnp.asarray(w, compute_dtype).T        # (E_in, E_out)
    r = lambda b: jnp.asarray(b, jnp.float32).reshape(1, -1)
    return (t(W_Q), t(W_K), t(W_V), r(b_Q), r(b_K), r(b_V), t(W_O), r(b_O))


# ---------------------------------------------------------------------------
# Forward pass (replicates the torch module's semantics)
# ---------------------------------------------------------------------------
def custom_mha_forward(query, key, value, prepared_params, num_heads, *,
                       heads_per_block=None, return_weights=True,
                       compute_dtype=jnp.float32):
    wqt, wkt, wvt, bq, bk, bv, wot, bo = prepared_params
    L, N, E = query.shape
    head_dim = E // num_heads
    assert head_dim * num_heads == E
    # matches the torch module's inferred_dim arithmetic (== L)
    inferred_dim = (L * N * E) // (N * num_heads * head_dim)
    M = L * N

    xq = query.reshape(M, E).astype(compute_dtype)
    xk = key.reshape(M, E).astype(compute_dtype)
    xv = value.reshape(M, E).astype(compute_dtype)

    q2, k2, v2 = qkv_proj(xq, xk, xv, wqt, wkt, wvt, bq, bk, bv,
                          out_dtype=compute_dtype)
    q3 = q2.reshape(inferred_dim, N, E)   # free reshapes, no transposes
    k3 = k2.reshape(inferred_dim, N, E)
    v3 = v2.reshape(inferred_dim, N, E)

    attn_out, attn_w = attention_core(
        q3, k3, v3, num_heads, head_dim,
        heads_per_block=heads_per_block, return_weights=return_weights)

    if N == 1:
        attn_merged = attn_out            # already the torch-merged (L, 1, E)
    else:
        # Replicate the torch module's literal reshape sequence (it interleaves
        # heads and batch in the merge when batch_size > 1).
        a4 = attn_out.reshape(inferred_dim, N, num_heads, head_dim)
        attn_merged = jnp.transpose(a4, (0, 2, 1, 3)).reshape(inferred_dim, N, E)

    out2 = linear_proj(
        attn_merged.reshape(inferred_dim * N, E).astype(compute_dtype),
        wot, bo, out_dtype=jnp.float32)
    output = out2.reshape(inferred_dim, N, E)

    attn_weights = None
    if return_weights:
        # (H, N, L, L) -> (H*N, L, L): exactly torch's b = h*N + n ordering.
        attn_weights = attn_w.reshape(num_heads * N, inferred_dim, inferred_dim)
    return output, attn_weights


# ---------------------------------------------------------------------------
# Pure-JAX reference for sanity check
# ---------------------------------------------------------------------------
def reference_forward(query, key, value, params, num_heads):
    W_Q, W_K, W_V, b_Q, b_K, b_V, W_O, b_O = params
    L, N, E = query.shape
    D = E // num_heads
    Q = query @ W_Q.T + b_Q
    K = key @ W_K.T + b_K
    V = value @ W_V.T + b_V

    def split(x):
        x = x.reshape(L, N, num_heads, D).transpose(0, 2, 1, 3)
        x = x.reshape(L, N * num_heads, D).transpose(1, 0, 2)
        return x

    Qh, Kh, Vh = split(Q), split(K), split(V)
    scores = (Qh @ jnp.swapaxes(Kh, -2, -1)) / (D ** 0.5)
    weights = jax.nn.softmax(scores, axis=-1)
    attn = weights @ Vh
    attn = jnp.transpose(attn, (1, 0, 2)).reshape(L, N, E)
    out = attn @ W_O.T + b_O
    return out, weights


if __name__ == "__main__":
    # small deterministic config (embed_dim divisible by num_heads=12)
    num_heads = 12
    embed_dim = 96
    seq_len = 8
    batch = 1

    key0 = jax.random.PRNGKey(0)
    keys = jax.random.split(key0, 11)
    scale = 0.05
    W_Q = scale * jax.random.normal(keys[0], (embed_dim, embed_dim), jnp.float32)
    W_K = scale * jax.random.normal(keys[1], (embed_dim, embed_dim), jnp.float32)
    W_V = scale * jax.random.normal(keys[2], (embed_dim, embed_dim), jnp.float32)
    W_O = scale * jax.random.normal(keys[3], (embed_dim, embed_dim), jnp.float32)
    b_Q = scale * jax.random.normal(keys[4], (embed_dim,), jnp.float32)
    b_K = scale * jax.random.normal(keys[5], (embed_dim,), jnp.float32)
    b_V = scale * jax.random.normal(keys[6], (embed_dim,), jnp.float32)
    b_O = scale * jax.random.normal(keys[7], (embed_dim,), jnp.float32)
    params = (W_Q, W_K, W_V, b_Q, b_K, b_V, W_O, b_O)

    query = jax.random.normal(keys[8], (seq_len, batch, embed_dim), jnp.float32)
    key_in = jax.random.normal(keys[9], (seq_len, batch, embed_dim), jnp.float32)
    value = jax.random.normal(keys[10], (seq_len, batch, embed_dim), jnp.float32)

    # weight transposes / bias reshapes done once, outside the forward
    prepared = prepare_params(params)

    fwd = jax.jit(functools.partial(custom_mha_forward, num_heads=num_heads))
    out, attn_w = fwd(query, key_in, value, prepared)
    out = jax.block_until_ready(out)
    attn_w = jax.block_until_ready(attn_w)

    ref_out, ref_w = reference_forward(query, key_in, value, params, num_heads)
    assert out.shape == (seq_len, batch, embed_dim)
    assert attn_w.shape == (batch * num_heads, seq_len, seq_len)
    assert jnp.allclose(out, ref_out, atol=1e-4, rtol=1e-4)
    assert jnp.allclose(attn_w, ref_w, atol=1e-5, rtol=1e-5)

    print("KERNEL_OK")
</pallas_src>

<mosaic_0001>
module attributes {stable_mosaic.version = 11 : i64} {
  func.func @_qkv_proj_kernel(%arg0: i32, %arg1: memref<8x96xf32, #tpu.memory_space<vmem>>, %arg2: memref<8x96xf32, #tpu.memory_space<vmem>>, %arg3: memref<8x96xf32, #tpu.memory_space<vmem>>, %arg4: memref<96x96xf32, #tpu.memory_space<vmem>>, %arg5: memref<96x96xf32, #tpu.memory_space<vmem>>, %arg6: memref<96x96xf32, #tpu.memory_space<vmem>>, %arg7: memref<1x96xf32, #tpu.memory_space<vmem>>, %arg8: memref<1x96xf32, #tpu.memory_space<vmem>>, %arg9: memref<1x96xf32, #tpu.memory_space<vmem>>, %arg10: memref<8x96xf32, #tpu.memory_space<vmem>>, %arg11: memref<8x96xf32, #tpu.memory_space<vmem>>, %arg12: memref<8x96xf32, #tpu.memory_space<vmem>>) attributes {dimension_semantics = [#tpu.dimension_semantics<parallel>], iteration_bounds = array<i64: 1>, scalar_prefetch = 0 : i64, scratch_operands = 0 : i64, tpu.core_type = #tpu.core_type<tc>, window_params = [{transform_indices = @transform_0, window_bounds = array<i64: 8, 96>}, {transform_indices = @transform_1, window_bounds = array<i64: 8, 96>}, {transform_indices = @transform_2, window_bounds = array<i64: 8, 96>}, {pipeline_mode = #tpu.pipeline_mode<synchronous>, transform_indices = @transform_3, window_bounds = array<i64: 96, 96>}, {pipeline_mode = #tpu.pipeline_mode<synchronous>, transform_indices = @transform_4, window_bounds = array<i64: 96, 96>}, {pipeline_mode = #tpu.pipeline_mode<synchronous>, transform_indices = @transform_5, window_bounds = array<i64: 96, 96>}, {pipeline_mode = #tpu.pipeline_mode<synchronous>, transform_indices = @transform_6, window_bounds = array<i64: 1, 96>}, {pipeline_mode = #tpu.pipeline_mode<synchronous>, transform_indices = @transform_7, window_bounds = array<i64: 1, 96>}, {pipeline_mode = #tpu.pipeline_mode<synchronous>, transform_indices = @transform_8, window_bounds = array<i64: 1, 96>}, {transform_indices = @transform_9, window_bounds = array<i64: 8, 96>}, {transform_indices = @transform_10, window_bounds = array<i64: 8, 96>}, {transform_indices = @transform_11, window_bounds = array<i64: 8, 96>}]} {
    %c0 = arith.constant 0 : index
    %c0_0 = arith.constant 0 : index
    %0 = vector.load %arg1[%c0, %c0_0] : memref<8x96xf32, #tpu.memory_space<vmem>>, vector<8x96xf32>
    %c0_1 = arith.constant 0 : index
    %c0_2 = arith.constant 0 : index
    %1 = vector.load %arg4[%c0_1, %c0_2] : memref<96x96xf32, #tpu.memory_space<vmem>>, vector<96x96xf32>
    %cst = arith.constant dense<0.000000e+00> : vector<8x96xf32>
    %2 = tpu.matmul %0, %1, %cst {dimension_numbers = #tpu.dot_dimension_numbers<[1], [0], [0], [1], [0, 0, 1, 1], [], []>} : vector<8x96xf32>, vector<96x96xf32>, vector<8x96xf32> -> vector<8x96xf32>
    %c0_3 = arith.constant 0 : index
    %c0_4 = arith.constant 0 : index
    %3 = vector.load %arg7[%c0_3, %c0_4] : memref<1x96xf32, #tpu.memory_space<vmem>>, vector<1x96xf32>
    %4 = vector.broadcast %3 : vector<1x96xf32> to vector<8x96xf32>
    %5 = arith.addf %2, %4 : vector<8x96xf32>
    %c0_5 = arith.constant 0 : index
    %c0_6 = arith.constant 0 : index
    %6 = vector.load %arg10[%c0_5, %c0_6] : memref<8x96xf32, #tpu.memory_space<vmem>>, vector<8x96xf32>
    tpu.vector_store %arg10[%c0_5, %c0_6], %5 {strides = array<i32>} : memref<8x96xf32, #tpu.memory_space<vmem>>, vector<8x96xf32>,
    %c0_7 = arith.constant 0 : index
    %c0_8 = arith.constant 0 : index
    %7 = vector.load %arg2[%c0_7, %c0_8] : memref<8x96xf32, #tpu.memory_space<vmem>>, vector<8x96xf32>
    %c0_9 = arith.constant 0 : index
    %c0_10 = arith.constant 0 : index
    %8 = vector.load %arg5[%c0_9, %c0_10] : memref<96x96xf32, #tpu.memory_space<vmem>>, vector<96x96xf32>
    %cst_11 = arith.constant dense<0.000000e+00> : vector<8x96xf32>
    %9 = tpu.matmul %7, %8, %cst_11 {dimension_numbers = #tpu.dot_dimension_numbers<[1], [0], [0], [1], [0, 0, 1, 1], [], []>} : vector<8x96xf32>, vector<96x96xf32>, vector<8x96xf32> -> vector<8x96xf32>
    %c0_12 = arith.constant 0 : index
    %c0_13 = arith.constant 0 : index
    %10 = vector.load %arg8[%c0_12, %c0_13] : memref<1x96xf32, #tpu.memory_space<vmem>>, vector<1x96xf32>
    %11 = vector.broadcast %10 : vector<1x96xf32> to vector<8x96xf32>
    %12 = arith.addf %9, %11 : vector<8x96xf32>
    %c0_14 = arith.constant 0 : index
    %c0_15 = arith.constant 0 : index
    %13 = vector.load %arg11[%c0_14, %c0_15] : memref<8x96xf32, #tpu.memory_space<vmem>>, vector<8x96xf32>
    tpu.vector_store %arg11[%c0_14, %c0_15], %12 {strides = array<i32>} : memref<8x96xf32, #tpu.memory_space<vmem>>, vector<8x96xf32>,
    %c0_16 = arith.constant 0 : index
    %c0_17 = arith.constant 0 : index
    %14 = vector.load %arg3[%c0_16, %c0_17] : memref<8x96xf32, #tpu.memory_space<vmem>>, vector<8x96xf32>
    %c0_18 = arith.constant 0 : index
    %c0_19 = arith.constant 0 : index
    %15 = vector.load %arg6[%c0_18, %c0_19] : memref<96x96xf32, #tpu.memory_space<vmem>>, vector<96x96xf32>
    %cst_20 = arith.constant dense<0.000000e+00> : vector<8x96xf32>
    %16 = tpu.matmul %14, %15, %cst_20 {dimension_numbers = #tpu.dot_dimension_numbers<[1], [0], [0], [1], [0, 0, 1, 1], [], []>} : vector<8x96xf32>, vector<96x96xf32>, vector<8x96xf32> -> vector<8x96xf32>
    %c0_21 = arith.constant 0 : index
    %c0_22 = arith.constant 0 : index
    %17 = vector.load %arg9[%c0_21, %c0_22] : memref<1x96xf32, #tpu.memory_space<vmem>>, vector<1x96xf32>
    %18 = vector.broadcast %17 : vector<1x96xf32> to vector<8x96xf32>
    %19 = arith.addf %16, %18 : vector<8x96xf32>
    %c0_23 = arith.constant 0 : index
    %c0_24 = arith.constant 0 : index
    %20 = vector.load %arg12[%c0_23, %c0_24] : memref<8x96xf32, #tpu.memory_space<vmem>>, vector<8x96xf32>
    tpu.vector_store %arg12[%c0_23, %c0_24], %19 {strides = array<i32>} : memref<8x96xf32, #tpu.memory_space<vmem>>, vector<8x96xf32>,
    return
  }
  func.func @transform_0(%arg0: i32) -> (i32, i32) {
    %c0_i32 = arith.constant 0 : i32
    %c0_i32_0 = arith.constant 0 : i32
    return %arg0, %c0_i32 : i32, i32
  }
  func.func @transform_1(%arg0: i32) -> (i32, i32) {
    %c0_i32 = arith.constant 0 : i32
    %c0_i32_0 = arith.constant 0 : i32
    return %arg0, %c0_i32 : i32, i32
  }
  func.func @transform_2(%arg0: i32) -> (i32, i32) {
    %c0_i32 = arith.constant 0 : i32
    %c0_i32_0 = arith.constant 0 : i32
    return %arg0, %c0_i32 : i32, i32
  }
  func.func @transform_3(%arg0: i32) -> (i32, i32) {
    %c0_i32 = arith.constant 0 : i32
    %c0_i32_0 = arith.constant 0 : i32
    %c0_i32_1 = arith.constant 0 : i32
    return %c0_i32, %c0_i32_0 : i32, i32
  }
  func.func @transform_4(%arg0: i32) -> (i32, i32) {
    %c0_i32 = arith.constant 0 : i32
    %c0_i32_0 = arith.constant 0 : i32
    %c0_i32_1 = arith.constant 0 : i32
    return %c0_i32, %c0_i32_0 : i32, i32
  }
  func.func @transform_5(%arg0: i32) -> (i32, i32) {
    %c0_i32 = arith.constant 0 : i32
    %c0_i32_0 = arith.constant 0 : i32
    %c0_i32_1 = arith.constant 0 : i32
    return %c0_i32, %c0_i32_0 : i32, i32
  }
  func.func @transform_6(%arg0: i32) -> (i32, i32) {
    %c0_i32 = arith.constant 0 : i32
    %c0_i32_0 = arith.constant 0 : i32
    %c0_i32_1 = arith.constant 0 : i32
    return %c0_i32, %c0_i32_0 : i32, i32
  }
  func.func @transform_7(%arg0: i32) -> (i32, i32) {
    %c0_i32 = arith.constant 0 : i32
    %c0_i32_0 = arith.constant 0 : i32
    %c0_i32_1 = arith.constant 0 : i32
    return %c0_i32, %c0_i32_0 : i32, i32
  }
  func.func @transform_8(%arg0: i32) -> (i32, i32) {
    %c0_i32 = arith.constant 0 : i32
    %c0_i32_0 = arith.constant 0 : i32
    %c0_i32_1 = arith.constant 0 : i32
    return %c0_i32, %c0_i32_0 : i32, i32
  }
  func.func @transform_9(%arg0: i32) -> (i32, i32) {
    %c0_i32 = arith.constant 0 : i32
    %c0_i32_0 = arith.constant 0 : i32
    return %arg0, %c0_i32 : i32, i32
  }
  func.func @transform_10(%arg0: i32) -> (i32, i32) {
    %c0_i32 = arith.constant 0 : i32
    %c0_i32_0 = arith.constant 0 : i32
    return %arg0, %c0_i32 : i32, i32
  }
  func.func @transform_11(%arg0: i32) -> (i32, i32) {
    %c0_i32 = arith.constant 0 : i32
    %c0_i32_0 = arith.constant 0 : i32
    return %arg0, %c0_i32 : i32, i32
  }
}

module attributes {stable_mosaic.version = 11 : i64} {
  func.func @_attn_kernel(%arg0: i32, %arg1: i32, %arg2: memref<8x1x96xf32, #tpu.memory_space<vmem>>, %arg3: memref<8x1x96xf32, #tpu.memory_space<vmem>>, %arg4: memref<8x1x96xf32, #tpu.memory_space<vmem>>, %arg5: memref<8x1x96xf32, #tpu.memory_space<vmem>>, %arg6: memref<12x1x8x8xf32, #tpu.memory_space<vmem>>) attributes {dimension_semantics = [#tpu.dimension_semantics<parallel>, #tpu.dimension_semantics<parallel>], iteration_bounds = array<i64: 1, 1>, scalar_prefetch = 0 : i64, scratch_operands = 0 : i64, tpu.core_type = #tpu.core_type<tc>, window_params = [{transform_indices = @transform_0, window_bounds = array<i64: 8, 1, 96>}, {transform_indices = @transform_1, window_bounds = array<i64: 8, 1, 96>}, {transform_indices = @transform_2, window_bounds = array<i64: 8, 1, 96>}, {transform_indices = @transform_3, window_bounds = array<i64: 8, 1, 96>}, {transform_indices = @transform_4, window_bounds = array<i64: 12, 1, 8, 8>}]} {
    %c0 = arith.constant 0 : index
    %c0_0 = arith.constant 0 : index
    %c0_1 = arith.constant 0 : index
    %0 = vector.load %arg2[%c0, %c0_0, %c0_1] : memref<8x1x96xf32, #tpu.memory_space<vmem>>, vector<8x1x96xf32>
    %1 = vector.shape_cast %0 : vector<8x1x96xf32> to vector<8x96xf32>
    %cst = arith.constant 0.353553385 : f32
    %2 = vector.broadcast %cst : f32 to vector<8x96xf32>
    %3 = arith.mulf %1, %2 : vector<8x96xf32>
    %c0_2 = arith.constant 0 : index
    %c0_3 = arith.constant 0 : index
    %c0_4 = arith.constant 0 : index
    %4 = vector.load %arg3[%c0_2, %c0_3, %c0_4] : memref<8x1x96xf32, #tpu.memory_space<vmem>>, vector<8x1x96xf32>
    %5 = vector.shape_cast %4 : vector<8x1x96xf32> to vector<8x96xf32>
    %c0_5 = arith.constant 0 : index
    %c0_6 = arith.constant 0 : index
    %c0_7 = arith.constant 0 : index
    %6 = vector.load %arg4[%c0_5, %c0_6, %c0_7] : memref<8x1x96xf32, #tpu.memory_space<vmem>>, vector<8x1x96xf32>
    %7 = vector.shape_cast %6 : vector<8x1x96xf32> to vector<8x96xf32>
    %8 = vector.extract_strided_slice %3 {offsets = [0, 0], sizes = [8, 8], strides = [1, 1]} : vector<8x96xf32> to vector<8x8xf32>
    %9 = vector.extract_strided_slice %5 {offsets = [0, 0], sizes = [8, 8], strides = [1, 1]} : vector<8x96xf32> to vector<8x8xf32>
    %10 = vector.extract_strided_slice %7 {offsets = [0, 0], sizes = [8, 8], strides = [1, 1]} : vector<8x96xf32> to vector<8x8xf32>
    %cst_8 = arith.constant dense<0.000000e+00> : vector<8x8xf32>
    %11 = tpu.matmul %8, %9, %cst_8 {dimension_numbers = #tpu.dot_dimension_numbers<[1], [1], [0], [0], [0, 0, 1, 0], [], []>} : vector<8x8xf32>, vector<8x8xf32>, vector<8x8xf32> -> vector<8x8xf32>
    %cst_9 = arith.constant dense<0xFF800000> : vector<8xf32>
    %12 = vector.multi_reduction <maximumf>, %11, %cst_9 [1] : vector<8x8xf32> to vector<8xf32>
    %13 = vector.shape_cast %12 : vector<8xf32> to vector<8x1xf32>
    %14 = vector.broadcast %13 : vector<8x1xf32> to vector<8x8xf32>
    %15 = arith.subf %11, %14 : vector<8x8xf32>
    %16 = math.exp %15 : vector<8x8xf32>
    %cst_10 = arith.constant dense<0.000000e+00> : vector<8xf32>
    %17 = vector.multi_reduction <add>, %16, %cst_10 [1] : vector<8x8xf32> to vector<8xf32>
    %18 = vector.shape_cast %17 : vector<8xf32> to vector<8x1xf32>
    %19 = tpu.reciprocal %18 : vector<8x1xf32> -> vector<8x1xf32>
    %20 = vector.broadcast %19 : vector<8x1xf32> to vector<8x8xf32>
    %21 = arith.mulf %16, %20 : vector<8x8xf32>
    %c0_11 = arith.constant 0 : index
    %c0_12 = arith.constant 0 : index
    %c0_13 = arith.constant 0 : index
    %c0_14 = arith.constant 0 : index
    %22 = vector.load %arg6[%c0_11, %c0_12, %c0_13, %c0_14] : memref<12x1x8x8xf32, #tpu.memory_space<vmem>>, vector<1x1x8x8xf32>
    %23 = vector.shape_cast %22 : vector<1x1x8x8xf32> to vector<8x8xf32>
    %24 = vector.shape_cast %21 : vector<8x8xf32> to vector<1x1x8x8xf32>
    tpu.vector_store %arg6[%c0_11, %c0_12, %c0_13, %c0_14], %24 {strides = array<i32>} : memref<12x1x8x8xf32, #tpu.memory_space<vmem>>, vector<1x1x8x8xf32>,
    %cst_15 = arith.constant dense<0.000000e+00> : vector<8x8xf32>
    %25 = tpu.matmul %21, %10, %cst_15 {dimension_numbers = #tpu.dot_dimension_numbers<[1], [0], [0], [1], [0, 0, 1, 1], [], []>} : vector<8x8xf32>, vector<8x8xf32>, vector<8x8xf32> -> vector<8x8xf32>
    %26 = vector.extract_strided_slice %3 {offsets = [0, 8], sizes = [8, 8], strides = [1, 1]} : vector<8x96xf32> to vector<8x8xf32>
    %27 = vector.extract_strided_slice %5 {offsets = [0, 8], sizes = [8, 8], strides = [1, 1]} : vector<8x96xf32> to vector<8x8xf32>
    %28 = vector.extract_strided_slice %7 {offsets = [0, 8], sizes = [8, 8], strides = [1, 1]} : vector<8x96xf32> to vector<8x8xf32>
    %cst_16 = arith.constant dense<0.000000e+00> : vector<8x8xf32>
    %29 = tpu.matmul %26, %27, %cst_16 {dimension_numbers = #tpu.dot_dimension_numbers<[1], [1], [0], [0], [0, 0, 1, 0], [], []>} : vector<8x8xf32>, vector<8x8xf32>, vector<8x8xf32> -> vector<8x8xf32>
    %cst_17 = arith.constant dense<0xFF800000> : vector<8xf32>
    %30 = vector.multi_reduction <maximumf>, %29, %cst_17 [1] : vector<8x8xf32> to vector<8xf32>
    %31 = vector.shape_cast %30 : vector<8xf32> to vector<8x1xf32>
    %32 = vector.broadcast %31 : vector<8x1xf32> to vector<8x8xf32>
    %33 = arith.subf %29, %32 : vector<8x8xf32>
    %34 = math.exp %33 : vector<8x8xf32>
    %cst_18 = arith.constant dense<0.000000e+00> : vector<8xf32>
    %35 = vector.multi_reduction <add>, %34, %cst_18 [1] : vector<8x8xf32> to vector<8xf32>
    %36 = vector.shape_cast %35 : vector<8xf32> to vector<8x1xf32>
    %37 = tpu.reciprocal %36 : vector<8x1xf32> -> vector<8x1xf32>
    %38 = vector.broadcast %37 : vector<8x1xf32> to vector<8x8xf32>
    %39 = arith.mulf %34, %38 : vector<8x8xf32>
    %c1 = arith.constant 1 : index
    %c0_19 = arith.constant 0 : index
    %c0_20 = arith.constant 0 : index
    %c0_21 = arith.constant 0 : index
    %40 = vector.load %arg6[%c1, %c0_19, %c0_20, %c0_21] : memref<12x1x8x8xf32, #tpu.memory_space<vmem>>, vector<1x1x8x8xf32>
    %41 = vector.shape_cast %40 : vector<1x1x8x8xf32> to vector<8x8xf32>
    %42 = vector.shape_cast %39 : vector<8x8xf32> to vector<1x1x8x8xf32>
    tpu.vector_store %arg6[%c1, %c0_19, %c0_20, %c0_21], %42 {strides = array<i32>} : memref<12x1x8x8xf32, #tpu.memory_space<vmem>>, vector<1x1x8x8xf32>,
    %cst_22 = arith.constant dense<0.000000e+00> : vector<8x8xf32>
    %43 = tpu.matmul %39, %28, %cst_22 {dimension_numbers = #tpu.dot_dimension_numbers<[1], [0], [0], [1], [0, 0, 1, 1], [], []>} : vector<8x8xf32>, vector<8x8xf32>, vector<8x8xf32> -> vector<8x8xf32>
    %44 = vector.extract_strided_slice %3 {offsets = [0, 16], sizes = [8, 8], strides = [1, 1]} : vector<8x96xf32> to vector<8x8xf32>
    %45 = vector.extract_strided_slice %5 {offsets = [0, 16], sizes = [8, 8], strides = [1, 1]} : vector<8x96xf32> to vector<8x8xf32>
    %46 = vector.extract_strided_slice %7 {offsets = [0, 16], sizes = [8, 8], strides = [1, 1]} : vector<8x96xf32> to vector<8x8xf32>
    %cst_23 = arith.constant dense<0.000000e+00> : vector<8x8xf32>
    %47 = tpu.matmul %44, %45, %cst_23 {dimension_numbers = #tpu.dot_dimension_numbers<[1], [1], [0], [0], [0, 0, 1, 0], [], []>} : vector<8x8xf32>, vector<8x8xf32>, vector<8x8xf32> -> vector<8x8xf32>
    %cst_24 = arith.constant dense<0xFF800000> : vector<8xf32>
    %48 = vector.multi_reduction <maximumf>, %47, %cst_24 [1] : vector<8x8xf32> to vector<8xf32>
    %49 = vector.shape_cast %48 : vector<8xf32> to vector<8x1xf32>
    %50 = vector.broadcast %49 : vector<8x1xf32> to vector<8x8xf32>
    %51 = arith.subf %47, %50 : vector<8x8xf32>
    %52 = math.exp %51 : vector<8x8xf32>
    %cst_25 = arith.constant dense<0.000000e+00> : vector<8xf32>
    %53 = vector.multi_reduction <add>, %52, %cst_25 [1] : vector<8x8xf32> to vector<8xf32>
    %54 = vector.shape_cast %53 : vector<8xf32> to vector<8x1xf32>
    %55 = tpu.reciprocal %54 : vector<8x1xf32> -> vector<8x1xf32>
    %56 = vector.broadcast %55 : vector<8x1xf32> to vector<8x8xf32>
    %57 = arith.mulf %52, %56 : vector<8x8xf32>
    %c2 = arith.constant 2 : index
    %c0_26 = arith.constant 0 : index
    %c0_27 = arith.constant 0 : index
    %c0_28 = arith.constant 0 : index
    %58 = vector.load %arg6[%c2, %c0_26, %c0_27, %c0_28] : memref<12x1x8x8xf32, #tpu.memory_space<vmem>>, vector<1x1x8x8xf32>
    %59 = vector.shape_cast %58 : vector<1x1x8x8xf32> to vector<8x8xf32>
    %60 = vector.shape_cast %57 : vector<8x8xf32> to vector<1x1x8x8xf32>
    tpu.vector_store %arg6[%c2, %c0_26, %c0_27, %c0_28], %60 {strides = array<i32>} : memref<12x1x8x8xf32, #tpu.memory_space<vmem>>, vector<1x1x8x8xf32>,
    %cst_29 = arith.constant dense<0.000000e+00> : vector<8x8xf32>
    %61 = tpu.matmul %57, %46, %cst_29 {dimension_numbers = #tpu.dot_dimension_numbers<[1], [0], [0], [1], [0, 0, 1, 1], [], []>} : vector<8x8xf32>, vector<8x8xf32>, vector<8x8xf32> -> vector<8x8xf32>
    %62 = vector.extract_strided_slice %3 {offsets = [0, 24], sizes = [8, 8], strides = [1, 1]} : vector<8x96xf32> to vector<8x8xf32>
    %63 = vector.extract_strided_slice %5 {offsets = [0, 24], sizes = [8, 8], strides = [1, 1]} : vector<8x96xf32> to vector<8x8xf32>
    %64 = vector.extract_strided_slice %7 {offsets = [0, 24], sizes = [8, 8], strides = [1, 1]} : vector<8x96xf32> to vector<8x8xf32>
    %cst_30 = arith.constant dense<0.000000e+00> : vector<8x8xf32>
    %65 = tpu.matmul %62, %63, %cst_30 {dimension_numbers = #tpu.dot_dimension_numbers<[1], [1], [0], [0], [0, 0, 1, 0], [], []>} : vector<8x8xf32>, vector<8x8xf32>, vector<8x8xf32> -> vector<8x8xf32>
    %cst_31 = arith.constant dense<0xFF800000> : vector<8xf32>
    %66 = vector.multi_reduction <maximumf>, %65, %cst_31 [1] : vector<8x8xf32> to vector<8xf32>
    %67 = vector.shape_cast %66 : vector<8xf32> to vector<8x1xf32>
    %68 = vector.broadcast %67 : vector<8x1xf32> to vector<8x8xf32>
    %69 = arith.subf %65, %68 : vector<8x8xf32>
    %70 = math.exp %69 : vector<8x8xf32>
    %cst_32 = arith.constant dense<0.000000e+00> : vector<8xf32>
    %71 = vector.multi_reduction <add>, %70, %cst_32 [1] : vector<8x8xf32> to vector<8xf32>
    %72 = vector.shape_cast %71 : vector<8xf32> to vector<8x1xf32>
    %73 = tpu.reciprocal %72 : vector<8x1xf32> -> vector<8x1xf32>
    %74 = vector.broadcast %73 : vector<8x1xf32> to vector<8x8xf32>
    %75 = arith.mulf %70, %74 : vector<8x8xf32>
    %c3 = arith.constant 3 : index
    %c0_33 = arith.constant 0 : index
    %c0_34 = arith.constant 0 : index
    %c0_35 = arith.constant 0 : index
    %76 = vector.load %arg6[%c3, %c0_33, %c0_34, %c0_35] : memref<12x1x8x8xf32, #tpu.memory_space<vmem>>, vector<1x1x8x8xf32>
    %77 = vector.shape_cast %76 : vector<1x1x8x8xf32> to vector<8x8xf32>
    %78 = vector.shape_cast %75 : vector<8x8xf32> to vector<1x1x8x8xf32>
    tpu.vector_store %arg6[%c3, %c0_33, %c0_34, %c0_35], %78 {strides = array<i32>} : memref<12x1x8x8xf32, #tpu.memory_space<vmem>>, vector<1x1x8x8xf32>,
    %cst_36 = arith.constant dense<0.000000e+00> : vector<8x8xf32>
    %79 = tpu.matmul %75, %64, %cst_36 {dimension_numbers = #tpu.dot_dimension_numbers<[1], [0], [0], [1], [0, 0, 1, 1], [], []>} : vector<8x8xf32>, vector<8x8xf32>, vector<8x8xf32> -> vector<8x8xf32>
    %80 = vector.extract_strided_slice %3 {offsets = [0, 32], sizes = [8, 8], strides = [1, 1]} : vector<8x96xf32> to vector<8x8xf32>
    %81 = vector.extract_strided_slice %5 {offsets = [0, 32], sizes = [8, 8], strides = [1, 1]} : vector<8x96xf32> to vector<8x8xf32>
    %82 = vector.extract_strided_slice %7 {offsets = [0, 32], sizes = [8, 8], strides = [1, 1]} : vector<8x96xf32> to vector<8x8xf32>
    %cst_37 = arith.constant dense<0.000000e+00> : vector<8x8xf32>
    %83 = tpu.matmul %80, %81, %cst_37 {dimension_numbers = #tpu.dot_dimension_numbers<[1], [1], [0], [0], [0, 0, 1, 0], [], []>} : vector<8x8xf32>, vector<8x8xf32>, vector<8x8xf32> -> vector<8x8xf32>
    %cst_38 = arith.constant dense<0xFF800000> : vector<8xf32>
    %84 = vector.multi_reduction <maximumf>, %83, %cst_38 [1] : vector<8x8xf32> to vector<8xf32>
    %85 = vector.shape_cast %84 : vector<8xf32> to vector<8x1xf32>
    %86 = vector.broadcast %85 : vector<8x1xf32> to vector<8x8xf32>
    %87 = arith.subf %83, %86 : vector<8x8xf32>
    %88 = math.exp %87 : vector<8x8xf32>
    %cst_39 = arith.constant dense<0.000000e+00> : vector<8xf32>
    %89 = vector.multi_reduction <add>, %88, %cst_39 [1] : vector<8x8xf32> to vector<8xf32>
    %90 = vector.shape_cast %89 : vector<8xf32> to vector<8x1xf32>
    %91 = tpu.reciprocal %90 : vector<8x1xf32> -> vector<8x1xf32>
    %92 = vector.broadcast %91 : vector<8x1xf32> to vector<8x8xf32>
    %93 = arith.mulf %88, %92 : vector<8x8xf32>
    %c4 = arith.constant 4 : index
    %c0_40 = arith.constant 0 : index
    %c0_41 = arith.constant 0 : index
    %c0_42 = arith.constant 0 : index
    %94 = vector.load %arg6[%c4, %c0_40, %c0_41, %c0_42] : memref<12x1x8x8xf32, #tpu.memory_space<vmem>>, vector<1x1x8x8xf32>
    %95 = vector.shape_cast %94 : vector<1x1x8x8xf32> to vector<8x8xf32>
    %96 = vector.shape_cast %93 : vector<8x8xf32> to vector<1x1x8x8xf32>
    tpu.vector_store %arg6[%c4, %c0_40, %c0_41, %c0_42], %96 {strides = array<i32>} : memref<12x1x8x8xf32, #tpu.memory_space<vmem>>, vector<1x1x8x8xf32>,
    %cst_43 = arith.constant dense<0.000000e+00> : vector<8x8xf32>
    %97 = tpu.matmul %93, %82, %cst_43 {dimension_numbers = #tpu.dot_dimension_numbers<[1], [0], [0], [1], [0, 0, 1, 1], [], []>} : vector<8x8xf32>, vector<8x8xf32>, vector<8x8xf32> -> vector<8x8xf32>
    %98 = vector.extract_strided_slice %3 {offsets = [0, 40], sizes = [8, 8], strides = [1, 1]} : vector<8x96xf32> to vector<8x8xf32>
    %99 = vector.extract_strided_slice %5 {offsets = [0, 40], sizes = [8, 8], strides = [1, 1]} : vector<8x96xf32> to vector<8x8xf32>
    %100 = vector.extract_strided_slice %7 {offsets = [0, 40], sizes = [8, 8], strides = [1, 1]} : vector<8x96xf32> to vector<8x8xf32>
    %cst_44 = arith.constant dense<0.000000e+00> : vector<8x8xf32>
    %101 = tpu.matmul %98, %99, %cst_44 {dimension_numbers = #tpu.dot_dimension_numbers<[1], [1], [0], [0], [0, 0, 1, 0], [], []>} : vector<8x8xf32>, vector<8x8xf32>, vector<8x8xf32> -> vector<8x8xf32>
    %cst_45 = arith.constant dense<0xFF800000> : vector<8xf32>
    %102 = vector.multi_reduction <maximumf>, %101, %cst_45 [1] : vector<8x8xf32> to vector<8xf32>
    %103 = vector.shape_cast %102 : vector<8xf32> to vector<8x1xf32>
    %104 = vector.broadcast %103 : vector<8x1xf32> to vector<8x8xf32>
    %105 = arith.subf %101, %104 : vector<8x8xf32>
    %106 = math.exp %105 : vector<8x8xf32>
    %cst_46 = arith.constant dense<0.000000e+00> : vector<8xf32>
    %107 = vector.multi_reduction <add>, %106, %cst_46 [1] : vector<8x8xf32> to vector<8xf32>
    %108 = vector.shape_cast %107 : vector<8xf32> to vector<8x1xf32>
    %109 = tpu.reciprocal %108 : vector<8x1xf32> -> vector<8x1xf32>
    %110 = vector.broadcast %109 : vector<8x1xf32> to vector<8x8xf32>
    %111 = arith.mulf %106, %110 : vector<8x8xf32>
    %c5 = arith.constant 5 : index
    %c0_47 = arith.constant 0 : index
    %c0_48 = arith.constant 0 : index
    %c0_49 = arith.constant 0 : index
    %112 = vector.load %arg6[%c5, %c0_47, %c0_48, %c0_49] : memref<12x1x8x8xf32, #tpu.memory_space<vmem>>, vector<1x1x8x8xf32>
    %113 = vector.shape_cast %112 : vector<1x1x8x8xf32> to vector<8x8xf32>
    %114 = vector.shape_cast %111 : vector<8x8xf32> to vector<1x1x8x8xf32>
    tpu.vector_store %arg6[%c5, %c0_47, %c0_48, %c0_49], %114 {strides = array<i32>} : memref<12x1x8x8xf32, #tpu.memory_space<vmem>>, vector<1x1x8x8xf32>,
    %cst_50 = arith.constant dense<0.000000e+00> : vector<8x8xf32>
    %115 = tpu.matmul %111, %100, %cst_50 {dimension_numbers = #tpu.dot_dimension_numbers<[1], [0], [0], [1], [0, 0, 1, 1], [], []>} : vector<8x8xf32>, vector<8x8xf32>, vector<8x8xf32> -> vector<8x8xf32>
    %116 = vector.extract_strided_slice %3 {offsets = [0, 48], sizes = [8, 8], strides = [1, 1]} : vector<8x96xf32> to vector<8x8xf32>
    %117 = vector.extract_strided_slice %5 {offsets = [0, 48], sizes = [8, 8], strides = [1, 1]} : vector<8x96xf32> to vector<8x8xf32>
    %118 = vector.extract_strided_slice %7 {offsets = [0, 48], sizes = [8, 8], strides = [1, 1]} : vector<8x96xf32> to vector<8x8xf32>
    %cst_51 = arith.constant dense<0.000000e+00> : vector<8x8xf32>
    %119 = tpu.matmul %116, %117, %cst_51 {dimension_numbers = #tpu.dot_dimension_numbers<[1], [1], [0], [0], [0, 0, 1, 0], [], []>} : vector<8x8xf32>, vector<8x8xf32>, vector<8x8xf32> -> vector<8x8xf32>
    %cst_52 = arith.constant dense<0xFF800000> : vector<8xf32>
    %120 = vector.multi_reduction <maximumf>, %119, %cst_52 [1] : vector<8x8xf32> to vector<8xf32>
    %121 = vector.shape_cast %120 : vector<8xf32> to vector<8x1xf32>
    %122 = vector.broadcast %121 : vector<8x1xf32> to vector<8x8xf32>
    %123 = arith.subf %119, %122 : vector<8x8xf32>
    %124 = math.exp %123 : vector<8x8xf32>
    %cst_53 = arith.constant dense<0.000000e+00> : vector<8xf32>
    %125 = vector.multi_reduction <add>, %124, %cst_53 [1] : vector<8x8xf32> to vector<8xf32>
    %126 = vector.shape_cast %125 : vector<8xf32> to vector<8x1xf32>
    %127 = tpu.reciprocal %126 : vector<8x1xf32> -> vector<8x1xf32>
    %128 = vector.broadcast %127 : vector<8x1xf32> to vector<8x8xf32>
    %129 = arith.mulf %124, %128 : vector<8x8xf32>
    %c6 = arith.constant 6 : index
    %c0_54 = arith.constant 0 : index
    %c0_55 = arith.constant 0 : index
    %c0_56 = arith.constant 0 : index
    %130 = vector.load %arg6[%c6, %c0_54, %c0_55, %c0_56] : memref<12x1x8x8xf32, #tpu.memory_space<vmem>>, vector<1x1x8x8xf32>
    %131 = vector.shape_cast %130 : vector<1x1x8x8xf32> to vector<8x8xf32>
    %132 = vector.shape_cast %129 : vector<8x8xf32> to vector<1x1x8x8xf32>
    tpu.vector_store %arg6[%c6, %c0_54, %c0_55, %c0_56], %132 {strides = array<i32>} : memref<12x1x8x8xf32, #tpu.memory_space<vmem>>, vector<1x1x8x8xf32>,
    %cst_57 = arith.constant dense<0.000000e+00> : vector<8x8xf32>
    %133 = tpu.matmul %129, %118, %cst_57 {dimension_numbers = #tpu.dot_dimension_numbers<[1], [0], [0], [1], [0, 0, 1, 1], [], []>} : vector<8x8xf32>, vector<8x8xf32>, vector<8x8xf32> -> vector<8x8xf32>
    %134 = vector.extract_strided_slice %3 {offsets = [0, 56], sizes = [8, 8], strides = [1, 1]} : vector<8x96xf32> to vector<8x8xf32>
    %135 = vector.extract_strided_slice %5 {offsets = [0, 56], sizes = [8, 8], strides = [1, 1]} : vector<8x96xf32> to vector<8x8xf32>
    %136 = vector.extract_strided_slice %7 {offsets = [0, 56], sizes = [8, 8], strides = [1, 1]} : vector<8x96xf32> to vector<8x8xf32>
    %cst_58 = arith.constant dense<0.000000e+00> : vector<8x8xf32>
    %137 = tpu.matmul %134, %135, %cst_58 {dimension_numbers = #tpu.dot_dimension_numbers<[1], [1], [0], [0], [0, 0, 1, 0], [], []>} : vector<8x8xf32>, vector<8x8xf32>, vector<8x8xf32> -> vector<8x8xf32>
    %cst_59 = arith.constant dense<0xFF800000> : vector<8xf32>
    %138 = vector.multi_reduction <maximumf>, %137, %cst_59 [1] : vector<8x8xf32> to vector<8xf32>
    %139 = vector.shape_cast %138 : vector<8xf32> to vector<8x1xf32>
    %140 = vector.broadcast %139 : vector<8x1xf32> to vector<8x8xf32>
    %141 = arith.subf %137, %140 : vector<8x8xf32>
    %142 = math.exp %141 : vector<8x8xf32>
    %cst_60 = arith.constant dense<0.000000e+00> : vector<8xf32>
    %143 = vector.multi_reduction <add>, %142, %cst_60 [1] : vector<8x8xf32> to vector<8xf32>
    %144 = vector.shape_cast %143 : vector<8xf32> to vector<8x1xf32>
    %145 = tpu.reciprocal %144 : vector<8x1xf32> -> vector<8x1xf32>
    %146 = vector.broadcast %145 : vector<8x1xf32> to vector<8x8xf32>
    %147 = arith.mulf %142, %146 : vector<8x8xf32>
    %c7 = arith.constant 7 : index
    %c0_61 = arith.constant 0 : index
    %c0_62 = arith.constant 0 : index
    %c0_63 = arith.constant 0 : index
    %148 = vector.load %arg6[%c7, %c0_61, %c0_62, %c0_63] : memref<12x1x8x8xf32, #tpu.memory_space<vmem>>, vector<1x1x8x8xf32>
    %149 = vector.shape_cast %148 : vector<1x1x8x8xf32> to vector<8x8xf32>
    %150 = vector.shape_cast %147 : vector<8x8xf32> to vector<1x1x8x8xf32>
    tpu.vector_store %arg6[%c7, %c0_61, %c0_62, %c0_63], %150 {strides = array<i32>} : memref<12x1x8x8xf32, #tpu.memory_space<vmem>>, vector<1x1x8x8xf32>,
    %cst_64 = arith.constant dense<0.000000e+00> : vector<8x8xf32>
    %151 = tpu.matmul %147, %136, %cst_64 {dimension_numbers = #tpu.dot_dimension_numbers<[1], [0], [0], [1], [0, 0, 1, 1], [], []>} : vector<8x8xf32>, vector<8x8xf32>, vector<8x8xf32> -> vector<8x8xf32>
    %152 = vector.extract_strided_slice %3 {offsets = [0, 64], sizes = [8, 8], strides = [1, 1]} : vector<8x96xf32> to vector<8x8xf32>
    %153 = vector.extract_strided_slice %5 {offsets = [0, 64], sizes = [8, 8], strides = [1, 1]} : vector<8x96xf32> to vector<8x8xf32>
    %154 = vector.extract_strided_slice %7 {offsets = [0, 64], sizes = [8, 8], strides = [1, 1]} : vector<8x96xf32> to vector<8x8xf32>
    %cst_65 = arith.constant dense<0.000000e+00> : vector<8x8xf32>
    %155 = tpu.matmul %152, %153, %cst_65 {dimension_numbers = #tpu.dot_dimension_numbers<[1], [1], [0], [0], [0, 0, 1, 0], [], []>} : vector<8x8xf32>, vector<8x8xf32>, vector<8x8xf32> -> vector<8x8xf32>
    %cst_66 = arith.constant dense<0xFF800000> : vector<8xf32>
    %156 = vector.multi_reduction <maximumf>, %155, %cst_66 [1] : vector<8x8xf32> to vector<8xf32>
    %157 = vector.shape_cast %156 : vector<8xf32> to vector<8x1xf32>
    %158 = vector.broadcast %157 : vector<8x1xf32> to vector<8x8xf32>
    %159 = arith.subf %155, %158 : vector<8x8xf32>
    %160 = math.exp %159 : vector<8x8xf32>
    %cst_67 = arith.constant dense<0.000000e+00> : vector<8xf32>
    %161 = vector.multi_reduction <add>, %160, %cst_67 [1] : vector<8x8xf32> to vector<8xf32>
    %162 = vector.shape_cast %161 : vector<8xf32> to vector<8x1xf32>
    %163 = tpu.reciprocal %162 : vector<8x1xf32> -> vector<8x1xf32>
    %164 = vector.broadcast %163 : vector<8x1xf32> to vector<8x8xf32>
    %165 = arith.mulf %160, %164 : vector<8x8xf32>
    %c8 = arith.constant 8 : index
    %c0_68 = arith.constant 0 : index
    %c0_69 = arith.constant 0 : index
    %c0_70 = arith.constant 0 : index
    %166 = vector.load %arg6[%c8, %c0_68, %c0_69, %c0_70] : memref<12x1x8x8xf32, #tpu.memory_space<vmem>>, vector<1x1x8x8xf32>
    %167 = vector.shape_cast %166 : vector<1x1x8x8xf32> to vector<8x8xf32>
    %168 = vector.shape_cast %165 : vector<8x8xf32> to vector<1x1x8x8xf32>
    tpu.vector_store %arg6[%c8, %c0_68, %c0_69, %c0_70], %168 {strides = array<i32>} : memref<12x1x8x8xf32, #tpu.memory_space<vmem>>, vector<1x1x8x8xf32>,
    %cst_71 = arith.constant dense<0.000000e+00> : vector<8x8xf32>
    %169 = tpu.matmul %165, %154, %cst_71 {dimension_numbers = #tpu.dot_dimension_numbers<[1], [0], [0], [1], [0, 0, 1, 1], [], []>} : vector<8x8xf32>, vector<8x8xf32>, vector<8x8xf32> -> vector<8x8xf32>
    %170 = vector.extract_strided_slice %3 {offsets = [0, 72], sizes = [8, 8], strides = [1, 1]} : vector<8x96xf32> to vector<8x8xf32>
    %171 = vector.extract_strided_slice %5 {offsets = [0, 72], sizes = [8, 8], strides = [1, 1]} : vector<8x96xf32> to vector<8x8xf32>
    %172 = vector.extract_strided_slice %7 {offsets = [0, 72], sizes = [8, 8], strides = [1, 1]} : vector<8x96xf32> to vector<8x8xf32>
    %cst_72 = arith.constant dense<0.000000e+00> : vector<8x8xf32>
    %173 = tpu.matmul %170, %171, %cst_72 {dimension_numbers = #tpu.dot_dimension_numbers<[1], [1], [0], [0], [0, 0, 1, 0], [], []>} : vector<8x8xf32>, vector<8x8xf32>, vector<8x8xf32> -> vector<8x8xf32>
    %cst_73 = arith.constant dense<0xFF800000> : vector<8xf32>
    %174 = vector.multi_reduction <maximumf>, %173, %cst_73 [1] : vector<8x8xf32> to vector<8xf32>
    %175 = vector.shape_cast %174 : vector<8xf32> to vector<8x1xf32>
    %176 = vector.broadcast %175 : vector<8x1xf32> to vector<8x8xf32>
    %177 = arith.subf %173, %176 : vector<8x8xf32>
    %178 = math.exp %177 : vector<8x8xf32>
    %cst_74 = arith.constant dense<0.000000e+00> : vector<8xf32>
    %179 = vector.multi_reduction <add>, %178, %cst_74 [1] : vector<8x8xf32> to vector<8xf32>
    %180 = vector.shape_cast %179 : vector<8xf32> to vector<8x1xf32>
    %181 = tpu.reciprocal %180 : vector<8x1xf32> -> vector<8x1xf32>
    %182 = vector.broadcast %181 : vector<8x1xf32> to vector<8x8xf32>
    %183 = arith.mulf %178, %182 : vector<8x8xf32>
    %c9 = arith.constant 9 : index
    %c0_75 = arith.constant 0 : index
    %c0_76 = arith.constant 0 : index
    %c0_77 = arith.constant 0 : index
    %184 = vector.load %arg6[%c9, %c0_75, %c0_76, %c0_77] : memref<12x1x8x8xf32, #tpu.memory_space<vmem>>, vector<1x1x8x8xf32>
    %185 = vector.shape_cast %184 : vector<1x1x8x8xf32> to vector<8x8xf32>
    %186 = vector.shape_cast %183 : vector<8x8xf32> to vector<1x1x8x8xf32>
    tpu.vector_store %arg6[%c9, %c0_75, %c0_76, %c0_77], %186 {strides = array<i32>} : memref<12x1x8x8xf32, #tpu.memory_space<vmem>>, vector<1x1x8x8xf32>,
    %cst_78 = arith.constant dense<0.000000e+00> : vector<8x8xf32>
    %187 = tpu.matmul %183, %172, %cst_78 {dimension_numbers = #tpu.dot_dimension_numbers<[1], [0], [0], [1], [0, 0, 1, 1], [], []>} : vector<8x8xf32>, vector<8x8xf32>, vector<8x8xf32> -> vector<8x8xf32>
    %188 = vector.extract_strided_slice %3 {offsets = [0, 80], sizes = [8, 8], strides = [1, 1]} : vector<8x96xf32> to vector<8x8xf32>
    %189 = vector.extract_strided_slice %5 {offsets = [0, 80], sizes = [8, 8], strides = [1, 1]} : vector<8x96xf32> to vector<8x8xf32>
    %190 = vector.extract_strided_slice %7 {offsets = [0, 80], sizes = [8, 8], strides = [1, 1]} : vector<8x96xf32> to vector<8x8xf32>
    %cst_79 = arith.constant dense<0.000000e+00> : vector<8x8xf32>
    %191 = tpu.matmul %188, %189, %cst_79 {dimension_numbers = #tpu.dot_dimension_numbers<[1], [1], [0], [0], [0, 0, 1, 0], [], []>} : vector<8x8xf32>, vector<8x8xf32>, vector<8x8xf32> -> vector<8x8xf32>
    %cst_80 = arith.constant dense<0xFF800000> : vector<8xf32>
    %192 = vector.multi_reduction <maximumf>, %191, %cst_80 [1] : vector<8x8xf32> to vector<8xf32>
    %193 = vector.shape_cast %192 : vector<8xf32> to vector<8x1xf32>
    %194 = vector.broadcast %193 : vector<8x1xf32> to vector<8x8xf32>
    %195 = arith.subf %191, %194 : vector<8x8xf32>
    %196 = math.exp %195 : vector<8x8xf32>
    %cst_81 = arith.constant dense<0.000000e+00> : vector<8xf32>
    %197 = vector.multi_reduction <add>, %196, %cst_81 [1] : vector<8x8xf32> to vector<8xf32>
    %198 = vector.shape_cast %197 : vector<8xf32> to vector<8x1xf32>
    %199 = tpu.reciprocal %198 : vector<8x1xf32> -> vector<8x1xf32>
    %200 = vector.broadcast %199 : vector<8x1xf32> to vector<8x8xf32>
    %201 = arith.mulf %196, %200 : vector<8x8xf32>
    %c10 = arith.constant 10 : index
    %c0_82 = arith.constant 0 : index
    %c0_83 = arith.constant 0 : index
    %c0_84 = arith.constant 0 : index
    %202 = vector.load %arg6[%c10, %c0_82, %c0_83, %c0_84] : memref<12x1x8x8xf32, #tpu.memory_space<vmem>>, vector<1x1x8x8xf32>
    %203 = vector.shape_cast %202 : vector<1x1x8x8xf32> to vector<8x8xf32>
    %204 = vector.shape_cast %201 : vector<8x8xf32> to vector<1x1x8x8xf32>
    tpu.vector_store %arg6[%c10, %c0_82, %c0_83, %c0_84], %204 {strides = array<i32>} : memref<12x1x8x8xf32, #tpu.memory_space<vmem>>, vector<1x1x8x8xf32>,
    %cst_85 = arith.constant dense<0.000000e+00> : vector<8x8xf32>
    %205 = tpu.matmul %201, %190, %cst_85 {dimension_numbers = #tpu.dot_dimension_numbers<[1], [0], [0], [1], [0, 0, 1, 1], [], []>} : vector<8x8xf32>, vector<8x8xf32>, vector<8x8xf32> -> vector<8x8xf32>
    %206 = vector.extract_strided_slice %3 {offsets = [0, 88], sizes = [8, 8], strides = [1, 1]} : vector<8x96xf32> to vector<8x8xf32>
    %207 = vector.extract_strided_slice %5 {offsets = [0, 88], sizes = [8, 8], strides = [1, 1]} : vector<8x96xf32> to vector<8x8xf32>
    %208 = vector.extract_strided_slice %7 {offsets = [0, 88], sizes = [8, 8], strides = [1, 1]} : vector<8x96xf32> to vector<8x8xf32>
    %cst_86 = arith.constant dense<0.000000e+00> : vector<8x8xf32>
    %209 = tpu.matmul %206, %207, %cst_86 {dimension_numbers = #tpu.dot_dimension_numbers<[1], [1], [0], [0], [0, 0, 1, 0], [], []>} : vector<8x8xf32>, vector<8x8xf32>, vector<8x8xf32> -> vector<8x8xf32>
    %cst_87 = arith.constant dense<0xFF800000> : vector<8xf32>
    %210 = vector.multi_reduction <maximumf>, %209, %cst_87 [1] : vector<8x8xf32> to vector<8xf32>
    %211 = vector.shape_cast %210 : vector<8xf32> to vector<8x1xf32>
    %212 = vector.broadcast %211 : vector<8x1xf32> to vector<8x8xf32>
    %213 = arith.subf %209, %212 : vector<8x8xf32>
    %214 = math.exp %213 : vector<8x8xf32>
    %cst_88 = arith.constant dense<0.000000e+00> : vector<8xf32>
    %215 = vector.multi_reduction <add>, %214, %cst_88 [1] : vector<8x8xf32> to vector<8xf32>
    %216 = vector.shape_cast %215 : vector<8xf32> to vector<8x1xf32>
    %217 = tpu.reciprocal %216 : vector<8x1xf32> -> vector<8x1xf32>
    %218 = vector.broadcast %217 : vector<8x1xf32> to vector<8x8xf32>
    %219 = arith.mulf %214, %218 : vector<8x8xf32>
    %c11 = arith.constant 11 : index
    %c0_89 = arith.constant 0 : index
    %c0_90 = arith.constant 0 : index
    %c0_91 = arith.constant 0 : index
    %220 = vector.load %arg6[%c11, %c0_89, %c0_90, %c0_91] : memref<12x1x8x8xf32, #tpu.memory_space<vmem>>, vector<1x1x8x8xf32>
    %221 = vector.shape_cast %220 : vector<1x1x8x8xf32> to vector<8x8xf32>
    %222 = vector.shape_cast %219 : vector<8x8xf32> to vector<1x1x8x8xf32>
    tpu.vector_store %arg6[%c11, %c0_89, %c0_90, %c0_91], %222 {strides = array<i32>} : memref<12x1x8x8xf32, #tpu.memory_space<vmem>>, vector<1x1x8x8xf32>,
    %cst_92 = arith.constant dense<0.000000e+00> : vector<8x8xf32>
    %223 = tpu.matmul %219, %208, %cst_92 {dimension_numbers = #tpu.dot_dimension_numbers<[1], [0], [0], [1], [0, 0, 1, 1], [], []>} : vector<8x8xf32>, vector<8x8xf32>, vector<8x8xf32> -> vector<8x8xf32>
    %224 = tpu.concatenate %25, %43, %61, %79, %97, %115, %133, %151, %169, %187, %205, %223 in 1 : vector<8x8xf32>, vector<8x8xf32>, vector<8x8xf32>, vector<8x8xf32>, vector<8x8xf32>, vector<8x8xf32>, vector<8x8xf32>, vector<8x8xf32>, vector<8x8xf32>, vector<8x8xf32>, vector<8x8xf32>, vector<8x8xf32> -> vector<8x96xf32>
    %c0_93 = arith.constant 0 : index
    %c0_94 = arith.constant 0 : index
    %c0_95 = arith.constant 0 : index
    %225 = vector.load %arg5[%c0_93, %c0_94, %c0_95] : memref<8x1x96xf32, #tpu.memory_space<vmem>>, vector<8x1x96xf32>
    %226 = vector.shape_cast %225 : vector<8x1x96xf32> to vector<8x96xf32>
    %227 = vector.shape_cast %224 : vector<8x96xf32> to vector<8x1x96xf32>
    tpu.vector_store %arg5[%c0_93, %c0_94, %c0_95], %227 {strides = array<i32>} : memref<8x1x96xf32, #tpu.memory_space<vmem>>, vector<8x1x96xf32>,
    return
  }
  func.func @transform_0(%arg0: i32, %arg1: i32) -> (i32, i32, i32) {
    %c0_i32 = arith.constant 0 : i32
    %c0_i32_0 = arith.constant 0 : i32
    return %c0_i32, %arg0, %arg1 : i32, i32, i32
  }
  func.func @transform_1(%arg0: i32, %arg1: i32) -> (i32, i32, i32) {
    %c0_i32 = arith.constant 0 : i32
    %c0_i32_0 = arith.constant 0 : i32
    return %c0_i32, %arg0, %arg1 : i32, i32, i32
  }
  func.func @transform_2(%arg0: i32, %arg1: i32) -> (i32, i32, i32) {
    %c0_i32 = arith.constant 0 : i32
    %c0_i32_0 = arith.constant 0 : i32
    return %c0_i32, %arg0, %arg1 : i32, i32, i32
  }
  func.func @transform_3(%arg0: i32, %arg1: i32) -> (i32, i32, i32) {
    %c0_i32 = arith.constant 0 : i32
    %c0_i32_0 = arith.constant 0 : i32
    return %c0_i32, %arg0, %arg1 : i32, i32, i32
  }
  func.func @transform_4(%arg0: i32, %arg1: i32) -> (i32, i32, i32, i32) {
    %c0_i32 = arith.constant 0 : i32
    %c0_i32_0 = arith.constant 0 : i32
    %c0_i32_1 = arith.constant 0 : i32
    return %arg1, %arg0, %c0_i32, %c0_i32_0 : i32, i32, i32, i32
  }
}

module attributes {stable_mosaic.version = 11 : i64} {
  func.func @_linear_kernel(%arg0: i32, %arg1: memref<8x96xf32, #tpu.memory_space<vmem>>, %arg2: memref<96x96xf32, #tpu.memory_space<vmem>>, %arg3: memref<1x96xf32, #tpu.memory_space<vmem>>, %arg4: memref<8x96xf32, #tpu.memory_space<vmem>>) attributes {dimension_semantics = [#tpu.dimension_semantics<parallel>], iteration_bounds = array<i64: 1>, scalar_prefetch = 0 : i64, scratch_operands = 0 : i64, tpu.core_type = #tpu.core_type<tc>, window_params = [{transform_indices = @transform_0, window_bounds = array<i64: 8, 96>}, {pipeline_mode = #tpu.pipeline_mode<synchronous>, transform_indices = @transform_1, window_bounds = array<i64: 96, 96>}, {pipeline_mode = #tpu.pipeline_mode<synchronous>, transform_indices = @transform_2, window_bounds = array<i64: 1, 96>}, {transform_indices = @transform_3, window_bounds = array<i64: 8, 96>}]} {
    %c0 = arith.constant 0 : index
    %c0_0 = arith.constant 0 : index
    %0 = vector.load %arg1[%c0, %c0_0] : memref<8x96xf32, #tpu.memory_space<vmem>>, vector<8x96xf32>
    %c0_1 = arith.constant 0 : index
    %c0_2 = arith.constant 0 : index
    %1 = vector.load %arg2[%c0_1, %c0_2] : memref<96x96xf32, #tpu.memory_space<vmem>>, vector<96x96xf32>
    %cst = arith.constant dense<0.000000e+00> : vector<8x96xf32>
    %2 = tpu.matmul %0, %1, %cst {dimension_numbers = #tpu.dot_dimension_numbers<[1], [0], [0], [1], [0, 0, 1, 1], [], []>} : vector<8x96xf32>, vector<96x96xf32>, vector<8x96xf32> -> vector<8x96xf32>
    %c0_3 = arith.constant 0 : index
    %c0_4 = arith.constant 0 : index
    %3 = vector.load %arg3[%c0_3, %c0_4] : memref<1x96xf32, #tpu.memory_space<vmem>>, vector<1x96xf32>
    %4 = vector.broadcast %3 : vector<1x96xf32> to vector<8x96xf32>
    %5 = arith.addf %2, %4 : vector<8x96xf32>
    %c0_5 = arith.constant 0 : index
    %c0_6 = arith.constant 0 : index
    %6 = vector.load %arg4[%c0_5, %c0_6] : memref<8x96xf32, #tpu.memory_space<vmem>>, vector<8x96xf32>
    tpu.vector_store %arg4[%c0_5, %c0_6], %5 {strides = array<i32>} : memref<8x96xf32, #tpu.memory_space<vmem>>, vector<8x96xf32>,
    return
  }
  func.func @transform_0(%arg0: i32) -> (i32, i32) {
    %c0_i32 = arith.constant 0 : i32
    %c0_i32_0 = arith.constant 0 : i32
    return %arg0, %c0_i32 : i32, i32
  }
  func.func @transform_1(%arg0: i32) -> (i32, i32) {
    %c0_i32 = arith.constant 0 : i32
    %c0_i32_0 = arith.constant 0 : i32
    %c0_i32_1 = arith.constant 0 : i32
    return %c0_i32, %c0_i32_0 : i32, i32
  }
  func.func @transform_2(%arg0: i32) -> (i32, i32) {
    %c0_i32 = arith.constant 0 : i32
    %c0_i32_0 = arith.constant 0 : i32
    %c0_i32_1 = arith.constant 0 : i32
    return %c0_i32, %c0_i32_0 : i32, i32
  }
  func.func @transform_3(%arg0: i32) -> (i32, i32) {
    %c0_i32 = arith.constant 0 : i32
    %c0_i32_0 = arith.constant 0 : i32
    return %arg0, %c0_i32 : i32, i32
  }
}

</mosaic_0001>

<bundles_post_ra>
// kernel: custom_mha_forward.5
= control target key start
LH: loop header
LB: loop body
LE: loop exit
PB: predicated region body
PF: predicated region fallthrough
CT: control target
= control target key end

     0   :  { %8 = vsyncpa [#allocation3], 0  ;;  %s184_s0 = inlined_call_operand.vmem [shape: f32[8,96], index: 0, kind: input, shape index: {}]   ;;  %s185_s1 = inlined_call_operand.hbm [shape: f32[96,96], index: 1, kind: input, shape index: {}]   ;;  %s186_s2 = inlined_call_operand.vmem [shape: f32[1,96], index: 2, kind: input, shape index: {}]   ;;  %s187_s3 = inlined_call_operand.hbm [shape: f32[8,96], index: 3, kind: output, shape index: {}]  }
   0x1   :  { %9 = vsyncpa [#allocation4], 0  ;;  %s16_s14 = sshll.u32 %s185_s1, 4  ;;  %s148_s15 = smov [#allocation2]   ;;  %s17_s14 = int_to_ptr.hbm [resolvable:$true] %s16_s14 }
   0x2   :  { %s18_s16 = sshll.u32 %s148_s15, 4  ;;  %s149_s17 = smov 128   ;;  %s19_s16 = int_to_ptr.vmem [resolvable:$true] %s18_s16 }
   0x3   :  { %s150_s18 = smov 8  }
   0x4   :  { %24 = dma.hbm_to_vmem [thread:$0]  %s17_s14, 1536, %s19_s16, [#allocation3], %s149_s17, %s149_s17, %s150_s18  }
   0x5   :  { %144 = dma.done.wait [#allocation3], 1536  }
   0x6   :  { %145 = vsyncadd [#allocation3], 4294965760  ;;  %v43_v0 = vld [vmem:[#allocation2 + $0x58] sm:$0xff]  ;;  %v42_v1 = vld [vmem:[#allocation2 + $0x50] sm:$0xff]  ;;  %vm48_vm0 = vcmask 785408   ;;  %s151_s22 = smov [#allocation5]  }
   0x7   :  { %56 = vmatpush.msra.mxu0 %v43_v0  ;;  %v41_v2 = vld [vmem:[#allocation2 + $0x48] sm:$0xff]  ;;  %v40_v3 = vld [vmem:[#allocation2 + $0x40] sm:$0xff]  ;;  %v39_v4 = vld [vmem:[#allocation2 + $0x38] sm:$0xff]  ;;  %s78_s23 = sshll.u32 %s151_s22, 4  ;;  %s80_s26 = sshll.u32 %s187_s3, 4  ;;  %s79_s23 = int_to_ptr.vmem [resolvable:$true] %s78_s23  ;;  %s81_s26 = int_to_ptr.hbm [resolvable:$true] %s80_s26 }
   0x8   :  { %v38_v5 = vld [vmem:[#allocation2 + $0x30] sm:$0xff]  ;;  %v37_v6 = vld [vmem:[#allocation2 + $0x28] sm:$0xff]  ;;  %v36_v7 = vld [vmem:[#allocation2 + $0x20] sm:$0xff] }
   0x9   :  { %57 = vmatpush.msra.mxu0 %v42_v1  ;;  %v35_v8 = vld [vmem:[#allocation2 + $0x18] sm:$0xff]  ;;  %v34_v9 = vld [vmem:[#allocation2 + $0x10] sm:$0xff]  ;;  %v33_v10 = vld [vmem:[#allocation2 + $0x8] sm:$0xff] }
   0xa   :  { %v32_v11 = vld [vmem:[#allocation2] sm:$0xff] }
   0xb   :  { %58 = vmatpush.msra.mxu0 %v41_v2  ;;  %v31_v12 = vld [vmem:[%s184_s0] sm:$0xff] }
   0xc   :  { %v95_v13 = vld [vmem:[%s186_s2] ss:$0 sm:$0xff] }
   0xd   :  { %59 = vmatpush.msra.mxu0 %v40_v3 }
   0xf   :  { %60 = vmatpush.msra.mxu0 %v39_v4 }
  0x11   :  { %61 = vmatpush.msra.mxu0 %v38_v5 }
  0x13   :  { %62 = vmatpush.msra.mxu0 %v37_v6 }
  0x15   :  { %63 = vmatpush.msra.mxu0 %v36_v7 }
  0x17   :  { %64 = vmatpush.msra.mxu0 %v35_v8 }
  0x19   :  { %65 = vmatpush.msra.mxu0 %v34_v9 }
  0x1b   :  { %66 = vmatpush.msra.mxu0 %v33_v10 }
  0x1d   :  { %67 = vmatpush.msra.mxu0 %v32_v11 }
  0x1e   :  { %90 = vmatmul.msk.f32.vlgmr.msra.gmra.mxu0 %vm48_vm0, %v31_v12 }
  0x9b   :  { %v69_v14 = vpop.f32.mrf.mxu0 }
  0x9c   :  { %v70_v15 = vadd.f32 %v95_v13, %v69_v14 }
  0x9e   :  { %72 = vst.msk [vmem:[#allocation5] sm:$0xff] %vm48_vm0, %v70_v15 }
  0x9f   :  { %83 = dma.vmem_to_hbm [thread:$0]  %s79_s23, 128, %s81_s26, [#allocation4]  }
  0xa0   :  { %146 = dma.done.wait [#allocation4], 128  }
  0xa1   :  { %147 = vsyncadd [#allocation4], 4294967168 }
  0xa2   :  { %88 = vsyncpa [#allocation3], 1 }
  0xa3   :  { %89 = vsyncpa [#allocation4], 1 }

// kernel: custom_mha_forward.3
= control target key start
LH: loop header
LB: loop body
LE: loop exit
PB: predicated region body
PF: predicated region fallthrough
CT: control target
= control target key end

     0   :  { %17 = vsyncpa [#allocation3], 0  ;;  %s539_s0 = inlined_call_operand.hbm [shape: f32[8,96], index: 0, kind: input, shape index: {}]   ;;  %s540_s1 = inlined_call_operand.hbm [shape: f32[8,96], index: 1, kind: input, shape index: {}]   ;;  %s541_s2 = inlined_call_operand.hbm [shape: f32[8,96], index: 2, kind: input, shape index: {}]   ;;  %s542_s3 = inlined_call_operand.hbm [shape: f32[96,96], index: 3, kind: input, shape index: {}]   ;;  %s543_s4 = inlined_call_operand.hbm [shape: f32[96,96], index: 4, kind: input, shape index: {}]   ;;  %s544_s5 = inlined_call_operand.hbm [shape: f32[96,96], index: 5, kind: input, shape index: {}]   ;;  %s545_s6 = inlined_call_operand.vmem [shape: f32[1,96], index: 6, kind: input, shape index: {}]   ;;  %s546_s7 = inlined_call_operand.vmem [shape: f32[1,96], index: 7, kind: input, shape index: {}]   ;;  %s547_s8 = inlined_call_operand.vmem [shape: f32[1,96], index: 8, kind: input, shape index: {}]   ;;  %s548_s9 = inlined_call_operand.vmem [shape: f32[8,96], index: 9, kind: output, shape index: {0}]   ;;  %s549_s10 = inlined_call_operand.vmem [shape: f32[8,96], index: 10, kind: output, shape index: {1}]   ;;  %s550_s11 = inlined_call_operand.vmem [shape: f32[8,96], index: 11, kind: output, shape index: {2}]  }
   0x1   :  { %18 = vsyncpa [#allocation5], 0 }
   0x2   :  { %19 = vsyncpa [#allocation8], 0  ;;  %s37_s19 = sshll.u32 %s540_s1, 4  ;;  %s38_s19 = int_to_ptr.hbm [resolvable:$true] %s37_s19 }
   0x3   :  { %20 = vsyncpa [#allocation11], 0  ;;  %s429_s20 = smov [#allocation4]   ;;  %s58_s24 = sshll.u32 %s542_s3, 4  ;;  %s59_s24 = int_to_ptr.hbm [resolvable:$true] %s58_s24 }
   0x4   :  { %s39_s21 = sshll.u32 %s429_s20, 4  ;;  %s430_s25 = smov [#allocation7]   ;;  %s40_s21 = int_to_ptr.vmem [resolvable:$true] %s39_s21 }
   0x5   :  { %42 = dma.hbm_to_vmem [thread:$0]  %s38_s19, 128, %s40_s21, [#allocation5]  }
   0x6   :  { %s60_s26 = sshll.u32 %s430_s25, 4  ;;  %s431_s27 = smov 128   ;;  %s61_s26 = int_to_ptr.vmem [resolvable:$true] %s60_s26 }
   0x7   :  { %s432_s28 = smov 8   ;;  %s26_s1 = sshll.u32 %s539_s0, 4  ;;  %s27_s1 = int_to_ptr.hbm [resolvable:$true] %s26_s1 }
   0x8   :  { %66 = dma.hbm_to_vmem [thread:$0]  %s59_s24, 1536, %s61_s26, [#allocation8], %s431_s27, %s431_s27, %s432_s28  }
   0x9   :  { %s433_s12 = smov [#allocation2]   ;;  %s48_s3 = sshll.u32 %s541_s2, 4  ;;  %s49_s3 = int_to_ptr.hbm [resolvable:$true] %s48_s3 }
   0xa   :  { %s28_s13 = sshll.u32 %s433_s12, 4  ;;  %s434_s16 = smov [#allocation6]   ;;  %s29_s13 = int_to_ptr.vmem [resolvable:$true] %s28_s13 }
   0xb   :  { %31 = dma.hbm_to_vmem [thread:$0]  %s27_s1, 128, %s29_s13, [#allocation3]  }
   0xc   :  { %s50_s17 = sshll.u32 %s434_s16, 4  ;;  %s71_s20 = sshll.u32 %s543_s4, 4  ;;  %s51_s17 = int_to_ptr.vmem [resolvable:$true] %s50_s17  ;;  %s72_s20 = int_to_ptr.hbm [resolvable:$true] %s71_s20 }
   0xd   :  { %53 = dma.hbm_to_vmem [thread:$0]  %s49_s3, 128, %s51_s17, [#allocation5]  }
   0xe   :  { %s84_s22 = sshll.u32 %s544_s5, 4  ;;  %s435_s23 = smov [#allocation9]   ;;  %s85_s22 = int_to_ptr.hbm [resolvable:$true] %s84_s22 }
   0xf   :  { %s73_s24 = sshll.u32 %s435_s23, 4  ;;  %s436_s2 = smov [#allocation10]   ;;  %s74_s24 = int_to_ptr.vmem [resolvable:$true] %s73_s24 }
  0x10   :  { %79 = dma.hbm_to_vmem [thread:$0]  %s72_s20, 1536, %s74_s24, [#allocation8], %s431_s27, %s431_s27, %s432_s28  }
  0x11   :  { %s86_s25 = sshll.u32 %s436_s2, 4  ;;  %s87_s25 = int_to_ptr.vmem [resolvable:$true] %s86_s25 }
  0x12   :  { %92 = dma.hbm_to_vmem [thread:$0]  %s85_s22, 1536, %s87_s25, [#allocation11], %s431_s27, %s431_s27, %s432_s28  }
  0x13   :  { %421 = dma.done.wait [#allocation3], 128  }
  0x14   :  { %422 = vsyncadd [#allocation3], 4294967168 }
  0x15   :  { %423 = dma.done.wait [#allocation5], 256  }
  0x16   :  { %424 = vsyncadd [#allocation5], 4294967040 }
  0x17   :  { %425 = dma.done.wait [#allocation8], 3072  }
  0x18   :  { %426 = vsyncadd [#allocation8], 4294964224 }
  0x19   :  { %427 = dma.done.wait [#allocation11], 1536  }
  0x1a   :  { %428 = vsyncadd [#allocation11], 4294965760  ;;  %v218_v0 = vld [vmem:[#allocation10 + $0x58] sm:$0xff]  ;;  %v217_v1 = vld [vmem:[#allocation10 + $0x50] sm:$0xff]  ;;  %vm140_vm0 = vcmask 785408  }
  0x1b   :  { %230 = vmatpush.msra.mxu2 %v218_v0  ;;  %v135_v2 = vld [vmem:[#allocation7 + $0x58] sm:$0xff]  ;;  %v216_v4 = vld [vmem:[#allocation10 + $0x48] sm:$0xff]  ;;  %v134_v5 = vld [vmem:[#allocation7 + $0x50] sm:$0xff] }
  0x1c   :  { %v177_v3 = vld [vmem:[#allocation9 + $0x58] sm:$0xff]  ;;  %148 = vmatpush.msra.mxu0 %v135_v2  ;;  %v176_v6 = vld [vmem:[#allocation9 + $0x50] sm:$0xff]  ;;  %v133_v7 = vld [vmem:[#allocation7 + $0x48] sm:$0xff] }
  0x1d   :  { %189 = vmatpush.msra.mxu1 %v177_v3  ;;  %231 = vmatpush.msra.mxu2 %v217_v1  ;;  %v175_v8 = vld [vmem:[#allocation9 + $0x48] sm:$0xff]  ;;  %v215_v9 = vld [vmem:[#allocation10 + $0x40] sm:$0xff]  ;;  %v214_v12 = vld [vmem:[#allocation10 + $0x38] sm:$0xff] }
  0x1e   :  { %149 = vmatpush.msra.mxu0 %v134_v5  ;;  %v132_v10 = vld [vmem:[#allocation7 + $0x40] sm:$0xff]  ;;  %v131_v13 = vld [vmem:[#allocation7 + $0x38] sm:$0xff]  ;;  %v213_v15 = vld [vmem:[#allocation10 + $0x30] sm:$0xff] }
  0x1f   :  { %190 = vmatpush.msra.mxu1 %v176_v6  ;;  %232 = vmatpush.msra.mxu2 %v216_v4  ;;  %v174_v11 = vld [vmem:[#allocation9 + $0x40] sm:$0xff]  ;;  %v173_v14 = vld [vmem:[#allocation9 + $0x38] sm:$0xff]  ;;  %v130_v16 = vld [vmem:[#allocation7 + $0x30] sm:$0xff] }
  0x20   :  { %150 = vmatpush.msra.mxu0 %v133_v7  ;;  %v172_v17 = vld [vmem:[#allocation9 + $0x30] sm:$0xff]  ;;  %v212_v18 = vld [vmem:[#allocation10 + $0x28] sm:$0xff]  ;;  %v211_v21 = vld [vmem:[#allocation10 + $0x20] sm:$0xff] }
  0x21   :  { %191 = vmatpush.msra.mxu1 %v175_v8  ;;  %233 = vmatpush.msra.mxu2 %v215_v9  ;;  %v129_v19 = vld [vmem:[#allocation7 + $0x28] sm:$0xff]  ;;  %v128_v22 = vld [vmem:[#allocation7 + $0x20] sm:$0xff]  ;;  %v210_v24 = vld [vmem:[#allocation10 + $0x18] sm:$0xff] }
  0x22   :  { %151 = vmatpush.msra.mxu0 %v132_v10  ;;  %v171_v20 = vld [vmem:[#allocation9 + $0x28] sm:$0xff]  ;;  %v170_v23 = vld [vmem:[#allocation9 + $0x20] sm:$0xff]  ;;  %v127_v25 = vld [vmem:[#allocation7 + $0x18] sm:$0xff] }
  0x23   :  { %192 = vmatpush.msra.mxu1 %v174_v11  ;;  %234 = vmatpush.msra.mxu2 %v214_v12  ;;  %v169_v26 = vld [vmem:[#allocation9 + $0x18] sm:$0xff]  ;;  %v209_v27 = vld [vmem:[#allocation10 + $0x10] sm:$0xff]  ;;  %v208_v30 = vld [vmem:[#allocation10 + $0x8] sm:$0xff] }
  0x24   :  { %152 = vmatpush.msra.mxu0 %v131_v13  ;;  %v126_v28 = vld [vmem:[#allocation7 + $0x10] sm:$0xff]  ;;  %v125_v31 = vld [vmem:[#allocation7 + $0x8] sm:$0xff]  ;;  %v207_v33 = vld [vmem:[#allocation10] sm:$0xff] }
  0x25   :  { %193 = vmatpush.msra.mxu1 %v173_v14  ;;  %235 = vmatpush.msra.mxu2 %v213_v15  ;;  %v168_v29 = vld [vmem:[#allocation9 + $0x10] sm:$0xff]  ;;  %v167_v32 = vld [vmem:[#allocation9 + $0x8] sm:$0xff]  ;;  %v206_v34 = vld [vmem:[#allocation6] sm:$0xff] }
  0x26   :  { %153 = vmatpush.msra.mxu0 %v130_v16  ;;  %v124_v35 = vld [vmem:[#allocation7] sm:$0xff]  ;;  %v123_v37 = vld [vmem:[#allocation2] sm:$0xff]  ;;  %v165_v38 = vld [vmem:[#allocation4] sm:$0xff] }
  0x27   :  { %194 = vmatpush.msra.mxu1 %v172_v17  ;;  %236 = vmatpush.msra.mxu2 %v212_v18  ;;  %v166_v36 = vld [vmem:[#allocation9] sm:$0xff]  ;;  %v274_v39 = vld [vmem:[%s545_s6] ss:$0 sm:$0xff] }
  0x28   :  { %154 = vmatpush.msra.mxu0 %v129_v19  ;;  %v275_v40 = vld [vmem:[%s546_s7] ss:$0 sm:$0xff] }
  0x29   :  { %195 = vmatpush.msra.mxu1 %v171_v20  ;;  %237 = vmatpush.msra.mxu2 %v211_v21  ;;  %v276_v45 = vld [vmem:[%s547_s8] ss:$0 sm:$0xff] }
  0x2a   :  { %155 = vmatpush.msra.mxu0 %v128_v22 }
  0x2b   :  { %196 = vmatpush.msra.mxu1 %v170_v23  ;;  %238 = vmatpush.msra.mxu2 %v210_v24 }
  0x2c   :  { %156 = vmatpush.msra.mxu0 %v127_v25 }
  0x2d   :  { %197 = vmatpush.msra.mxu1 %v169_v26  ;;  %239 = vmatpush.msra.mxu2 %v209_v27 }
  0x2e   :  { %157 = vmatpush.msra.mxu0 %v126_v28 }
  0x2f   :  { %198 = vmatpush.msra.mxu1 %v168_v29  ;;  %240 = vmatpush.msra.mxu2 %v208_v30 }
  0x30   :  { %158 = vmatpush.msra.mxu0 %v125_v31 }
  0x31   :  { %199 = vmatpush.msra.mxu1 %v167_v32  ;;  %241 = vmatpush.msra.mxu2 %v207_v33 }
  0x32   :  { %265 = vmatmul.msk.f32.vlgmr.msra.gmra.mxu2 %vm140_vm0, %v206_v34  ;;  %159 = vmatpush.msra.mxu0 %v124_v35 }
  0x33   :  { %200 = vmatpush.msra.mxu1 %v166_v36  ;;  %263 = vmatmul.msk.f32.vlgmr.msra.gmra.mxu0 %vm140_vm0, %v123_v37 }
  0x34   :  { %264 = vmatmul.msk.f32.vlgmr.msra.gmra.mxu1 %vm140_vm0, %v165_v38 }
  0xb0   :  { %v161_v41 = vpop.f32.mrf.mxu0 }
  0xb1   :  { %v162_v42 = vadd.f32 %v274_v39, %v161_v41  ;;  %v202_v43 = vpop.f32.mrf.mxu1 }
  0xb2   :  { %v203_v44 = vadd.f32 %v275_v40, %v202_v43 }
  0xb3   :  { %164 = vst.msk [vmem:[%s548_s9] sm:$0xff] %vm140_vm0, %v162_v42 }
  0xb4   :  { %205 = vst.msk [vmem:[%s549_s10] sm:$0xff] %vm140_vm0, %v203_v44 }
  0xb5   :  { %v243_v46 = vpop.f32.mrf.mxu2 }
  0xb6   :  { %v244_v47 = vadd.f32 %v276_v45, %v243_v46 }
  0xb8   :  { %246 = vst.msk [vmem:[%s550_s11] sm:$0xff] %vm140_vm0, %v244_v47 }
  0xb9   :  { %259 = vsyncpa [#allocation3], 1 }
  0xba   :  { %260 = vsyncpa [#allocation5], 1 }
  0xbb   :  { %261 = vsyncpa [#allocation8], 1 }
  0xbc   :  { %262 = vsyncpa [#allocation11], 1 }

// kernel: custom_mha_forward.4
= control target key start
LH: loop header
LB: loop body
LE: loop exit
PB: predicated region body
PF: predicated region fallthrough
CT: control target
= control target key end

     0   :  { %vm96_vm0 = vcmask 64512   ;;  %s1810_s8 = smov 112   ;;  %s1811_s9 = smov 104   ;;  %s2603_s0 = inlined_call_operand.vmem [shape: f32[8,1,96], index: 0, kind: input, shape index: {}]   ;;  %s2604_s1 = inlined_call_operand.vmem [shape: f32[8,1,96], index: 1, kind: input, shape index: {}]   ;;  %s2605_s2 = inlined_call_operand.vmem [shape: f32[8,1,96], index: 2, kind: input, shape index: {}]   ;;  %s2606_s4 = inlined_call_operand.vmem [shape: f32[12,1,8,8], index: 4, kind: output, shape index: {1}]   ;;  %s2607_s3 = inlined_call_operand.vmem [shape: f32[8,1,96], index: 3, kind: output, shape index: {0}]  }
   0x1   :  { %v16_v0 = vld [vmem:[%s2603_s0] sm:$0x1]  ;;  %v17_v1 = vld [vmem:[%s2603_s0 + $0x1] sm:$0x1]  ;;  %v18_v2 = vld [vmem:[%s2603_s0 + $0x2] sm:$0x1] }
   0x2   :  { %v19_v3 = vld [vmem:[%s2603_s0 + $0x3] sm:$0x1]  ;;  %v1861_v4 = vmul.f32 0.35355338, %v16_v0  ;;  %v20_v5 = vld [vmem:[%s2603_s0 + $0x4] sm:$0x1] }
   0x3   :  { %v1866_v6 = vmul.f32 0.35355338, %v17_v1  ;;  %v21_v7 = vld [vmem:[%s2603_s0 + $0x5] sm:$0x1]  ;;  %v1871_v8 = vmul.f32 0.35355338, %v18_v2 }
   0x4   :  { %v22_v9 = vld [vmem:[%s2603_s0 + $0x6] sm:$0x1]  ;;  %v1876_v10 = vmul.f32 0.35355338, %v19_v3  ;;  %v23_v11 = vld [vmem:[%s2603_s0 + $0x7] sm:$0x1] }
   0x5   :  { %v1881_v12 = vmul.f32 0.35355338, %v20_v5  ;;  %56 = vst [vmem:[#allocation1] ss:$9 sm:$0xff] %v1861_v4  ;;  %v1884_v13 = vmul.f32 0.35355338, %v21_v7 }
   0x6   :  { %58 = vst [vmem:[#allocation1 + $0x1] ss:$9 sm:$0xff] %v1866_v6  ;;  %v1887_v14 = vmul.f32 0.35355338, %v22_v9  ;;  %v1890_v15 = vmul.f32 0.35355338, %v23_v11 }
   0x7   :  { %60 = vst [vmem:[#allocation1 + $0x2] ss:$9 sm:$0xff] %v1871_v8  ;;  %v1900_v16 = vld [vmem:[%s2604_s1] sm:$0x1]  ;;  %v1905_v17 = vld [vmem:[%s2604_s1 + $0x1] sm:$0x1] }
   0x8   :  { %62 = vst [vmem:[#allocation1 + $0x3] ss:$9 sm:$0xff] %v1876_v10  ;;  %v1910_v18 = vld [vmem:[%s2604_s1 + $0x2] sm:$0x1]  ;;  %v1915_v20 = vld [vmem:[%s2604_s1 + $0x3] sm:$0x1] }
   0x9   :  { %64 = vst [vmem:[#allocation1 + $0x4] ss:$9 sm:$0xff] %v1881_v12  ;;  %v1921_v21 = vld [vmem:[%s2604_s1 + $0x4] sm:$0x1]  ;;  %v1927_v22 = vld [vmem:[%s2604_s1 + $0x5] sm:$0x1] }
   0xa   :  { %66 = vst [vmem:[#allocation1 + $0x5] ss:$9 sm:$0xff] %v1884_v13  ;;  %v1933_v23 = vld [vmem:[%s2604_s1 + $0x6] sm:$0x1]  ;;  %v1939_v24 = vld [vmem:[%s2604_s1 + $0x7] sm:$0x1] }
   0xb   :  { %68 = vst [vmem:[#allocation1 + $0x6] ss:$9 sm:$0xff] %v1887_v14  ;;  %v1948_v25 = vld [vmem:[%s2605_s2] sm:$0x1]  ;;  %v1953_v26 = vld [vmem:[%s2605_s2 + $0x1] sm:$0x1] }
   0xc   :  { %70 = vst [vmem:[#allocation1 + $0x7] ss:$9 sm:$0xff] %v1890_v15  ;;  %v1958_v28 = vld [vmem:[%s2605_s2 + $0x2] sm:$0x1]  ;;  %v1964_v29 = vld [vmem:[%s2605_s2 + $0x3] sm:$0x1] }
   0xd   :  { %v1970_v30 = vld [vmem:[%s2605_s2 + $0x4] sm:$0x1]  ;;  %v1976_v31 = vld [vmem:[%s2605_s2 + $0x5] sm:$0x1]  ;;  %v1983_v32 = vld [vmem:[%s2605_s2 + $0x6] sm:$0x1] }
   0xe   :  { %v1989_v33 = vld [vmem:[%s2605_s2 + $0x7] sm:$0x1]  ;;  %s1809_s2 = smov 120   ;;  %s1812_s10 = smov 96  }
   0xf   :  { %s1813_s11 = smov 88   ;;  %s1814_s12 = smov 80  }
  0x10   :  { %s1815_s13 = smov 72   ;;  %s1816_s14 = smov 64  }
  0x11   :  { %s1817_s15 = smov 56   ;;  %s1818_s16 = smov 48  }
  0x12   :  { %s1819_s17 = smov 40   ;;  %s1820_s25 = smov 8  }
  0x13   :  { %v71_v19 = vld [vmem:[#allocation1] sm:$0xff]  ;;  %s1821_s26 = smov 24   ;;  %s1823_s22 = smov 32  }
  0x14   :  { %80 = vst [vmem:[#allocation1] ss:$9 sm:$0xff] %v1900_v16 }
  0x15   :  { %82 = vst [vmem:[#allocation1 + $0x1] ss:$9 sm:$0xff] %v1905_v17 }
  0x16   :  { %84 = vst [vmem:[#allocation1 + $0x2] ss:$9 sm:$0xff] %v1910_v18 }
  0x17   :  { %86 = vst [vmem:[#allocation1 + $0x3] ss:$9 sm:$0xff] %v1915_v20 }
  0x18   :  { %88 = vst [vmem:[#allocation1 + $0x4] ss:$9 sm:$0xff] %v1921_v21 }
  0x19   :  { %90 = vst [vmem:[#allocation1 + $0x5] ss:$9 sm:$0xff] %v1927_v22 }
  0x1a   :  { %92 = vst [vmem:[#allocation1 + $0x6] ss:$9 sm:$0xff] %v1933_v23 }
  0x1b   :  { %94 = vst [vmem:[#allocation1 + $0x7] ss:$9 sm:$0xff] %v1939_v24 }
  0x22   :  { %v95_v27 = vld [vmem:[#allocation1] sm:$0xff] }
  0x23   :  { %1699 = vmatpush.xpose.msk.msra.mxu0 %vm96_vm0, %v95_v27  ;;  %154 = vst [vmem:[#allocation1] ss:$9 sm:$0xff] %v1948_v25 }
  0x24   :  { %156 = vst [vmem:[#allocation1 + $0x1] ss:$9 sm:$0xff] %v1953_v26 }
  0x25   :  { %158 = vst [vmem:[#allocation1 + $0x2] ss:$9 sm:$0xff] %v1958_v28 }
  0x26   :  { %1700 = vmatmul.msk.f32.vlgmr.msra.gmra.mxu0 %vm96_vm0, %v71_v19  ;;  %160 = vst [vmem:[#allocation1 + $0x3] ss:$9 sm:$0xff] %v1964_v29 }
  0x27   :  { %162 = vst [vmem:[#allocation1 + $0x4] ss:$9 sm:$0xff] %v1970_v30 }
  0x28   :  { %164 = vst [vmem:[#allocation1 + $0x5] ss:$9 sm:$0xff] %v1976_v31 }
  0x29   :  { %166 = vst [vmem:[#allocation1 + $0x6] ss:$9 sm:$0xff] %v1983_v32 }
  0x2a   :  { %168 = vst [vmem:[#allocation1 + $0x7] ss:$9 sm:$0xff] %v1989_v33 }
  0x31   :  { %v169_v34 = vld [vmem:[#allocation1] sm:$0xff] }
  0x32   :  { %194 = vst [vmem:[#allocation1] ss:$9 sm:$0xff] %v1861_v4  ;;  %189 = vmatpush.msra.mxu1 %v169_v34 }
  0x33   :  { %196 = vst [vmem:[#allocation1 + $0x1] ss:$9 sm:$0xff] %v1866_v6 }
  0x34   :  { %198 = vst [vmem:[#allocation1 + $0x2] ss:$9 sm:$0xff] %v1871_v8 }
  0x35   :  { %200 = vst [vmem:[#allocation1 + $0x3] ss:$9 sm:$0xff] %v1876_v10 }
  0x36   :  { %202 = vst [vmem:[#allocation1 + $0x4] ss:$9 sm:$0xff] %v1881_v12 }
  0x37   :  { %204 = vst [vmem:[#allocation1 + $0x5] ss:$9 sm:$0xff] %v1884_v13 }
  0x38   :  { %206 = vst [vmem:[#allocation1 + $0x6] ss:$9 sm:$0xff] %v1887_v14 }
  0x39   :  { %208 = vst [vmem:[#allocation1 + $0x7] ss:$9 sm:$0xff] %v1890_v15 }
  0x40   :  { %v209_v35 = vld [vmem:[#allocation1] sm:$0xff] }
  0x41   :  { %210 = vrot.lane.b32.xlu1 %v209_v35, %s1809_s2  ;;  %212 = vst [vmem:[#allocation1] ss:$9 sm:$0xff] %v1900_v16 }
  0x42   :  { %214 = vst [vmem:[#allocation1 + $0x1] ss:$9 sm:$0xff] %v1905_v17 }
  0x43   :  { %216 = vst [vmem:[#allocation1 + $0x2] ss:$9 sm:$0xff] %v1910_v18 }
  0x44   :  { %218 = vst [vmem:[#allocation1 + $0x3] ss:$9 sm:$0xff] %v1915_v20 }
  0x45   :  { %220 = vst [vmem:[#allocation1 + $0x4] ss:$9 sm:$0xff] %v1921_v21 }
  0x46   :  { %222 = vst [vmem:[#allocation1 + $0x5] ss:$9 sm:$0xff] %v1927_v22 }
  0x47   :  { %224 = vst [vmem:[#allocation1 + $0x6] ss:$9 sm:$0xff] %v1933_v23 }
  0x48   :  { %226 = vst [vmem:[#allocation1 + $0x7] ss:$9 sm:$0xff] %v1939_v24 }
  0x4f   :  { %v227_v36 = vld [vmem:[#allocation1] sm:$0xff] }
  0x50   :  { %228 = vrot.lane.b32.xlu1 %v227_v36, %s1809_s2  ;;  %280 = vst [vmem:[#allocation1] ss:$9 sm:$0xff] %v1948_v25 }
  0x51   :  { %282 = vst [vmem:[#allocation1 + $0x1] ss:$9 sm:$0xff] %v1953_v26 }
  0x52   :  { %284 = vst [vmem:[#allocation1 + $0x2] ss:$9 sm:$0xff] %v1958_v28 }
  0x53   :  { %286 = vst [vmem:[#allocation1 + $0x3] ss:$9 sm:$0xff] %v1964_v29 }
  0x54   :  { %288 = vst [vmem:[#allocation1 + $0x4] ss:$9 sm:$0xff] %v1970_v30 }
  0x55   :  { %290 = vst [vmem:[#allocation1 + $0x5] ss:$9 sm:$0xff] %v1976_v31 }
  0x56   :  { %292 = vst [vmem:[#allocation1 + $0x6] ss:$9 sm:$0xff] %v1983_v32 }
  0x57   :  { %294 = vst [vmem:[#allocation1 + $0x7] ss:$9 sm:$0xff] %v1989_v33 }
  0x5e   :  { %v2021_v37 = vld [vmem:[#allocation1] sm:$0xff] }
  0x5f   :  { %322 = vst [vmem:[#allocation1] ss:$9 sm:$0xff] %v1861_v4 }
  0x60   :  { %324 = vst [vmem:[#allocation1 + $0x1] ss:$9 sm:$0xff] %v1866_v6 }
  0x61   :  { %326 = vst [vmem:[#allocation1 + $0x2] ss:$9 sm:$0xff] %v1871_v8 }
  0x62   :  { %328 = vst [vmem:[#allocation1 + $0x3] ss:$9 sm:$0xff] %v1876_v10 }
  0x63   :  { %330 = vst [vmem:[#allocation1 + $0x4] ss:$9 sm:$0xff] %v1881_v12 }
  0x64   :  { %332 = vst [vmem:[#allocation1 + $0x5] ss:$9 sm:$0xff] %v1884_v13 }
  0x65   :  { %334 = vst [vmem:[#allocation1 + $0x6] ss:$9 sm:$0xff] %v1887_v14 }
  0x66   :  { %336 = vst [vmem:[#allocation1 + $0x7] ss:$9 sm:$0xff] %v1890_v15 }
  0x6d   :  { %v337_v38 = vld [vmem:[#allocation1] sm:$0xff] }
  0x6e   :  { %340 = vst [vmem:[#allocation1] ss:$9 sm:$0xff] %v1900_v16 }
  0x6f   :  { %342 = vst [vmem:[#allocation1 + $0x1] ss:$9 sm:$0xff] %v1905_v17 }
  0x70   :  { %344 = vst [vmem:[#allocation1 + $0x2] ss:$9 sm:$0xff] %v1910_v18 }
  0x71   :  { %346 = vst [vmem:[#allocation1 + $0x3] ss:$9 sm:$0xff] %v1915_v20 }
  0x72   :  { %348 = vst [vmem:[#allocation1 + $0x4] ss:$9 sm:$0xff] %v1921_v21 }
  0x73   :  { %350 = vst [vmem:[#allocation1 + $0x5] ss:$9 sm:$0xff] %v1927_v22 }
  0x74   :  { %352 = vst [vmem:[#allocation1 + $0x6] ss:$9 sm:$0xff] %v1933_v23 }
  0x75   :  { %354 = vst [vmem:[#allocation1 + $0x7] ss:$9 sm:$0xff] %v1939_v24 }
  0x7c   :  { %v355_v39 = vld [vmem:[#allocation1] sm:$0xff] }
  0x7d   :  { %408 = vst [vmem:[#allocation1] ss:$9 sm:$0xff] %v1948_v25  ;;  %356 = vrot.lane.b32.xlu2 %v355_v39, %s1810_s8 }
  0x7e   :  { %410 = vst [vmem:[#allocation1 + $0x1] ss:$9 sm:$0xff] %v1953_v26 }
  0x7f   :  { %412 = vst [vmem:[#allocation1 + $0x2] ss:$9 sm:$0xff] %v1958_v28 }
  0x80   :  { %414 = vst [vmem:[#allocation1 + $0x3] ss:$9 sm:$0xff] %v1964_v29 }
  0x81   :  { %416 = vst [vmem:[#allocation1 + $0x4] ss:$9 sm:$0xff] %v1970_v30 }
  0x82   :  { %418 = vst [vmem:[#allocation1 + $0x5] ss:$9 sm:$0xff] %v1976_v31 }
  0x83   :  { %420 = vst [vmem:[#allocation1 + $0x6] ss:$9 sm:$0xff] %v1983_v32 }
  0x84   :  { %422 = vst [vmem:[#allocation1 + $0x7] ss:$9 sm:$0xff] %v1989_v33 }
  0x8b   :  { %v2048_v40 = vld [vmem:[#allocation1] sm:$0xff] }
  0x8c   :  { %450 = vst [vmem:[#allocation1] ss:$9 sm:$0xff] %v1861_v4 }
  0x8d   :  { %452 = vst [vmem:[#allocation1 + $0x1] ss:$9 sm:$0xff] %v1866_v6 }
  0x8e   :  { %454 = vst [vmem:[#allocation1 + $0x2] ss:$9 sm:$0xff] %v1871_v8 }
  0x8f   :  { %456 = vst [vmem:[#allocation1 + $0x3] ss:$9 sm:$0xff] %v1876_v10 }
  0x90   :  { %458 = vst [vmem:[#allocation1 + $0x4] ss:$9 sm:$0xff] %v1881_v12 }
  0x91   :  { %460 = vst [vmem:[#allocation1 + $0x5] ss:$9 sm:$0xff] %v1884_v13 }
  0x92   :  { %462 = vst [vmem:[#allocation1 + $0x6] ss:$9 sm:$0xff] %v1887_v14 }
  0x93   :  { %464 = vst [vmem:[#allocation1 + $0x7] ss:$9 sm:$0xff] %v1890_v15 }
  0x9a   :  { %v465_v41 = vld [vmem:[#allocation1] sm:$0xff] }
  0x9b   :  { %466 = vrot.lane.b32.xlu1 %v465_v41, %s1811_s9  ;;  %468 = vst [vmem:[#allocation1] ss:$9 sm:$0xff] %v1900_v16 }
  0x9c   :  { %470 = vst [vmem:[#allocation1 + $0x1] ss:$9 sm:$0xff] %v1905_v17 }
  0x9d   :  { %472 = vst [vmem:[#allocation1 + $0x2] ss:$9 sm:$0xff] %v1910_v18 }
  0x9e   :  { %474 = vst [vmem:[#allocation1 + $0x3] ss:$9 sm:$0xff] %v1915_v20 }
  0x9f   :  { %476 = vst [vmem:[#allocation1 + $0x4] ss:$9 sm:$0xff] %v1921_v21 }
  0xa0   :  { %478 = vst [vmem:[#allocation1 + $0x5] ss:$9 sm:$0xff] %v1927_v22 }
  0xa1   :  { %480 = vst [vmem:[#allocation1 + $0x6] ss:$9 sm:$0xff] %v1933_v23 }
  0xa2   :  { %482 = vst [vmem:[#allocation1 + $0x7] ss:$9 sm:$0xff] %v1939_v24 }
  0xa3   :  { %v2067_v42 = vpop.f32.mrf.mxu0 }
  0xa4   :  { %v121_v43 = vsel %vm96_vm0, %v2067_v42, -inf }
  0xa5   :  { %122 = vmax.xlane.f32.xlu0 %v121_v43 }
  0xa9   :  { %v483_v44 = vld [vmem:[#allocation1] sm:$0xff] }
  0xaa   :  { %484 = vrot.lane.b32.xlu2 %v483_v44, %s1811_s9  ;;  %536 = vst [vmem:[#allocation1] ss:$9 sm:$0xff] %v1948_v25 }
  0xab   :  { %538 = vst [vmem:[#allocation1 + $0x1] ss:$9 sm:$0xff] %v1953_v26 }
  0xac   :  { %540 = vst [vmem:[#allocation1 + $0x2] ss:$9 sm:$0xff] %v1958_v28 }
  0xad   :  { %542 = vst [vmem:[#allocation1 + $0x3] ss:$9 sm:$0xff] %v1964_v29 }
  0xae   :  { %544 = vst [vmem:[#allocation1 + $0x4] ss:$9 sm:$0xff] %v1970_v30 }
  0xaf   :  { %546 = vst [vmem:[#allocation1 + $0x5] ss:$9 sm:$0xff] %v1976_v31 }
  0xb0   :  { %548 = vst [vmem:[#allocation1 + $0x6] ss:$9 sm:$0xff] %v1983_v32 }
  0xb1   :  { %550 = vst [vmem:[#allocation1 + $0x7] ss:$9 sm:$0xff] %v1989_v33 }
  0xb3   :  { %v211_v49 = vpop.permute.xlu1 %210 }
  0xb8   :  { %v2080_v45 = vld [vmem:[#allocation1] sm:$0xff] }
  0xb9   :  { %578 = vst [vmem:[#allocation1] ss:$9 sm:$0xff] %v1861_v4  ;;  %338 = vrot.lane.b32.xlu0 %v337_v38, %s1810_s8 }
  0xba   :  { %580 = vst [vmem:[#allocation1 + $0x1] ss:$9 sm:$0xff] %v1866_v6 }
  0xbb   :  { %582 = vst [vmem:[#allocation1 + $0x2] ss:$9 sm:$0xff] %v1871_v8 }
  0xbc   :  { %584 = vst [vmem:[#allocation1 + $0x3] ss:$9 sm:$0xff] %v1876_v10 }
  0xbd   :  { %586 = vst [vmem:[#allocation1 + $0x4] ss:$9 sm:$0xff] %v1881_v12 }
  0xbe   :  { %588 = vst [vmem:[#allocation1 + $0x5] ss:$9 sm:$0xff] %v1884_v13 }
  0xbf   :  { %590 = vst [vmem:[#allocation1 + $0x6] ss:$9 sm:$0xff] %v1887_v14 }
  0xc0   :  { %592 = vst [vmem:[#allocation1 + $0x7] ss:$9 sm:$0xff] %v1890_v15 }
  0xc2   :  { %v229_v52 = vpop.permute.xlu1 %228 }
  0xc3   :  { %1702 = vmatpush.xpose.msk.msra.mxu2 %vm96_vm0, %v229_v52 }
  0xc6   :  { %1703 = vmatmul.msk.f32.vlgmr.msra.gmra.mxu2 %vm96_vm0, %v211_v49 }
  0xc7   :  { %v593_v46 = vld [vmem:[#allocation1] sm:$0xff] }
  0xc8   :  { %596 = vst [vmem:[#allocation1] ss:$9 sm:$0xff] %v1900_v16 }
  0xc9   :  { %598 = vst [vmem:[#allocation1 + $0x1] ss:$9 sm:$0xff] %v1905_v17 }
  0xca   :  { %600 = vst [vmem:[#allocation1 + $0x2] ss:$9 sm:$0xff] %v1910_v18 }
  0xcb   :  { %602 = vst [vmem:[#allocation1 + $0x3] ss:$9 sm:$0xff] %v1915_v20 }
  0xcc   :  { %604 = vst [vmem:[#allocation1 + $0x4] ss:$9 sm:$0xff] %v1921_v21 }
  0xcd   :  { %606 = vst [vmem:[#allocation1 + $0x5] ss:$9 sm:$0xff] %v1927_v22 }
  0xce   :  { %608 = vst [vmem:[#allocation1 + $0x6] ss:$9 sm:$0xff] %v1933_v23 }
  0xcf   :  { %610 = vst [vmem:[#allocation1 + $0x7] ss:$9 sm:$0xff] %v1939_v24 }
  0xd6   :  { %v611_v47 = vld [vmem:[#allocation1] sm:$0xff] }
  0xd7   :  { %664 = vst [vmem:[#allocation1] ss:$9 sm:$0xff] %v1948_v25  ;;  %612 = vrot.lane.b32.xlu2 %v611_v47, %s1812_s10  ;;  %v357_v50 = vpop.permute.xlu2 %356 }
  0xd8   :  { %666 = vst [vmem:[#allocation1 + $0x1] ss:$9 sm:$0xff] %v1953_v26  ;;  %1706 = vmatpush.xpose.msk.msrb.mxu1 %vm96_vm0, %v357_v50 }
  0xd9   :  { %668 = vst [vmem:[#allocation1 + $0x2] ss:$9 sm:$0xff] %v1958_v28 }
  0xda   :  { %670 = vst [vmem:[#allocation1 + $0x3] ss:$9 sm:$0xff] %v1964_v29 }
  0xdb   :  { %672 = vst [vmem:[#allocation1 + $0x4] ss:$9 sm:$0xff] %v1970_v30 }
  0xdc   :  { %674 = vst [vmem:[#allocation1 + $0x5] ss:$9 sm:$0xff] %v1976_v31 }
  0xdd   :  { %676 = vst [vmem:[#allocation1 + $0x6] ss:$9 sm:$0xff] %v1983_v32 }
  0xde   :  { %678 = vst [vmem:[#allocation1 + $0x7] ss:$9 sm:$0xff] %v1989_v33 }
  0xdf   :  { %594 = vrot.lane.b32.xlu2 %v593_v46, %s1812_s10 }
  0xe5   :  { %v2109_v48 = vld [vmem:[#allocation1] sm:$0xff] }
  0xe6   :  { %706 = vst [vmem:[#allocation1] ss:$9 sm:$0xff] %v1861_v4 }
  0xe7   :  { %708 = vst [vmem:[#allocation1 + $0x1] ss:$9 sm:$0xff] %v1866_v6 }
  0xe8   :  { %710 = vst [vmem:[#allocation1 + $0x2] ss:$9 sm:$0xff] %v1871_v8 }
  0xe9   :  { %712 = vst [vmem:[#allocation1 + $0x3] ss:$9 sm:$0xff] %v1876_v10 }
  0xea   :  { %714 = vst [vmem:[#allocation1 + $0x4] ss:$9 sm:$0xff] %v1881_v12 }
  0xeb   :  { %716 = vst [vmem:[#allocation1 + $0x5] ss:$9 sm:$0xff] %v1884_v13 }
  0xec   :  { %718 = vst [vmem:[#allocation1 + $0x6] ss:$9 sm:$0xff] %v1887_v14 }
  0xed   :  { %720 = vst [vmem:[#allocation1 + $0x7] ss:$9 sm:$0xff] %v1890_v15 }
  0xf4   :  { %v721_v51 = vld [vmem:[#allocation1] sm:$0xff] }
  0xf5   :  { %724 = vst [vmem:[#allocation1] ss:$9 sm:$0xff] %v1900_v16 }
  0xf6   :  { %726 = vst [vmem:[#allocation1 + $0x1] ss:$9 sm:$0xff] %v1905_v17 }
  0xf7   :  { %728 = vst [vmem:[#allocation1 + $0x2] ss:$9 sm:$0xff] %v1910_v18 }
  0xf8   :  { %730 = vst [vmem:[#allocation1 + $0x3] ss:$9 sm:$0xff] %v1915_v20 }
  0xf9   :  { %732 = vst [vmem:[#allocation1 + $0x4] ss:$9 sm:$0xff] %v1921_v21 }
  0xfa   :  { %734 = vst [vmem:[#allocation1 + $0x5] ss:$9 sm:$0xff] %v1927_v22 }
  0xfb   :  { %736 = vst [vmem:[#allocation1 + $0x6] ss:$9 sm:$0xff] %v1933_v23 }
  0xfc   :  { %738 = vst [vmem:[#allocation1 + $0x7] ss:$9 sm:$0xff] %v1939_v24 }
 0x103   :  { %v739_v53 = vld [vmem:[#allocation1] sm:$0xff] }
 0x104   :  { %740 = vrot.lane.b32.xlu1 %v739_v53, %s1813_s11  ;;  %792 = vst [vmem:[#allocation1] ss:$9 sm:$0xff] %v1948_v25  ;;  %v485_v54 = vpop.permute.xlu2 %484 }
 0x105   :  { %794 = vst [vmem:[#allocation1 + $0x1] ss:$9 sm:$0xff] %v1953_v26  ;;  %1710 = vmatpush.xpose.msk.msrb.mxu0 %vm96_vm0, %v485_v54 }
 0x106   :  { %796 = vst [vmem:[#allocation1 + $0x2] ss:$9 sm:$0xff] %v1958_v28 }
 0x107   :  { %798 = vst [vmem:[#allocation1 + $0x3] ss:$9 sm:$0xff] %v1964_v29 }
 0x108   :  { %800 = vst [vmem:[#allocation1 + $0x4] ss:$9 sm:$0xff] %v1970_v30 }
 0x109   :  { %802 = vst [vmem:[#allocation1 + $0x5] ss:$9 sm:$0xff] %v1976_v31 }
 0x10a   :  { %804 = vst [vmem:[#allocation1 + $0x6] ss:$9 sm:$0xff] %v1983_v32 }
 0x10b   :  { %806 = vst [vmem:[#allocation1 + $0x7] ss:$9 sm:$0xff] %v1989_v33 }
 0x10c   :  { %722 = vrot.lane.b32.xlu1 %v721_v51, %s1813_s11 }
 0x10d   :  { %v467_v55 = vpop.permute.xlu1 %466 }
 0x10e   :  { %1711 = vmatmul.msk.f32.vlgmr.msrb.gmra.mxu0 %vm96_vm0, %v467_v55 }
 0x112   :  { %v2142_v56 = vld [vmem:[#allocation1] sm:$0xff] }
 0x113   :  { %834 = vst [vmem:[#allocation1] ss:$9 sm:$0xff] %v1861_v4 }
 0x114   :  { %836 = vst [vmem:[#allocation1 + $0x1] ss:$9 sm:$0xff] %v1866_v6 }
 0x115   :  { %838 = vst [vmem:[#allocation1 + $0x2] ss:$9 sm:$0xff] %v1871_v8 }
 0x116   :  { %840 = vst [vmem:[#allocation1 + $0x3] ss:$9 sm:$0xff] %v1876_v10 }
 0x117   :  { %842 = vst [vmem:[#allocation1 + $0x4] ss:$9 sm:$0xff] %v1881_v12 }
 0x118   :  { %844 = vst [vmem:[#allocation1 + $0x5] ss:$9 sm:$0xff] %v1884_v13  ;;  %v123_v9 = vpop.xlane.xlu0 %122 }
 0x119   :  { %846 = vst [vmem:[#allocation1 + $0x6] ss:$9 sm:$0xff] %v1887_v14  ;;  %v124_v11 = vsub.f32 %v2067_v42, %v123_v9 }
 0x11a   :  { %848 = vst [vmem:[#allocation1 + $0x7] ss:$9 sm:$0xff] %v1890_v15 }
 0x11b   :  { %v125_v19 = vmul.f32 1.442695, %v124_v11 }
 0x11d   :  { %1761 = vpow2.f32 %v125_v19 }
 0x121   :  { %v849_v57 = vld [vmem:[#allocation1] sm:$0xff] }
 0x122   :  { %850 = vrot.lane.b32.xlu1 %v849_v57, %s1814_s12  ;;  %852 = vst [vmem:[#allocation1] ss:$9 sm:$0xff] %v1900_v16 }
 0x123   :  { %854 = vst [vmem:[#allocation1 + $0x1] ss:$9 sm:$0xff] %v1905_v17  ;;  %v2281_v34 = vpop.eup %1761 }
 0x124   :  { %856 = vst [vmem:[#allocation1 + $0x2] ss:$9 sm:$0xff] %v1910_v18  ;;  %v127_v35 = vsel %vm96_vm0, %v2281_v34, 0.0 }
 0x125   :  { %858 = vst [vmem:[#allocation1 + $0x3] ss:$9 sm:$0xff] %v1915_v20  ;;  %128 = vadd.xlane.f32.xlu0 %v127_v35 }
 0x126   :  { %860 = vst [vmem:[#allocation1 + $0x4] ss:$9 sm:$0xff] %v1921_v21 }
 0x127   :  { %862 = vst [vmem:[#allocation1 + $0x5] ss:$9 sm:$0xff] %v1927_v22 }
 0x128   :  { %864 = vst [vmem:[#allocation1 + $0x6] ss:$9 sm:$0xff] %v1933_v23 }
 0x129   :  { %866 = vst [vmem:[#allocation1 + $0x7] ss:$9 sm:$0xff] %v1939_v24 }
 0x130   :  { %v867_v58 = vld [vmem:[#allocation1] sm:$0xff] }
 0x131   :  { %868 = vrot.lane.b32.xlu2 %v867_v58, %s1814_s12  ;;  %920 = vst [vmem:[#allocation1] ss:$9 sm:$0xff] %v1948_v25 }
 0x132   :  { %922 = vst [vmem:[#allocation1 + $0x1] ss:$9 sm:$0xff] %v1953_v26 }
 0x133   :  { %924 = vst [vmem:[#allocation1 + $0x2] ss:$9 sm:$0xff] %v1958_v28 }
 0x134   :  { %926 = vst [vmem:[#allocation1 + $0x3] ss:$9 sm:$0xff] %v1964_v29 }
 0x135   :  { %928 = vst [vmem:[#allocation1 + $0x4] ss:$9 sm:$0xff] %v1970_v30 }
 0x136   :  { %930 = vst [vmem:[#allocation1 + $0x5] ss:$9 sm:$0xff] %v1976_v31 }
 0x137   :  { %932 = vst [vmem:[#allocation1 + $0x6] ss:$9 sm:$0xff] %v1983_v32 }
 0x138   :  { %934 = vst [vmem:[#allocation1 + $0x7] ss:$9 sm:$0xff] %v1989_v33 }
 0x13f   :  { %v2170_v59 = vld [vmem:[#allocation1] sm:$0xff] }
 0x140   :  { %962 = vst [vmem:[#allocation1] ss:$9 sm:$0xff] %v1861_v4 }
 0x141   :  { %964 = vst [vmem:[#allocation1 + $0x1] ss:$9 sm:$0xff] %v1866_v6 }
 0x142   :  { %966 = vst [vmem:[#allocation1 + $0x2] ss:$9 sm:$0xff] %v1871_v8 }
 0x143   :  { %968 = vst [vmem:[#allocation1 + $0x3] ss:$9 sm:$0xff] %v1876_v10 }
 0x144   :  { %970 = vst [vmem:[#allocation1 + $0x4] ss:$9 sm:$0xff] %v1881_v12 }
 0x145   :  { %972 = vst [vmem:[#allocation1 + $0x5] ss:$9 sm:$0xff] %v1884_v13 }
 0x146   :  { %974 = vst [vmem:[#allocation1 + $0x6] ss:$9 sm:$0xff] %v1887_v14 }
 0x147   :  { %976 = vst [vmem:[#allocation1 + $0x7] ss:$9 sm:$0xff] %v1890_v15 }
 0x14e   :  { %v977_v60 = vld [vmem:[#allocation1] sm:$0xff] }
 0x14f   :  { %980 = vst [vmem:[#allocation1] ss:$9 sm:$0xff] %v1900_v16  ;;  %978 = vrot.lane.b32.xlu2 %v977_v60, %s1815_s13 }
 0x150   :  { %982 = vst [vmem:[#allocation1 + $0x1] ss:$9 sm:$0xff] %v1905_v17 }
 0x151   :  { %984 = vst [vmem:[#allocation1 + $0x2] ss:$9 sm:$0xff] %v1910_v18 }
 0x152   :  { %986 = vst [vmem:[#allocation1 + $0x3] ss:$9 sm:$0xff] %v1915_v20 }
 0x153   :  { %988 = vst [vmem:[#allocation1 + $0x4] ss:$9 sm:$0xff] %v1921_v21 }
 0x154   :  { %990 = vst [vmem:[#allocation1 + $0x5] ss:$9 sm:$0xff] %v1927_v22 }
 0x155   :  { %992 = vst [vmem:[#allocation1 + $0x6] ss:$9 sm:$0xff] %v1933_v23 }
 0x156   :  { %994 = vst [vmem:[#allocation1 + $0x7] ss:$9 sm:$0xff] %v1939_v24 }
 0x15d   :  { %v2189_v61 = vld [vmem:[#allocation1] sm:$0xff] }
 0x15e   :  { %1048 = vst [vmem:[#allocation1] ss:$9 sm:$0xff] %v1948_v25  ;;  %996 = vrot.lane.b32.xlu0 %v2189_v61, %s1815_s13 }
 0x15f   :  { %1050 = vst [vmem:[#allocation1 + $0x1] ss:$9 sm:$0xff] %v1953_v26 }
 0x160   :  { %1052 = vst [vmem:[#allocation1 + $0x2] ss:$9 sm:$0xff] %v1958_v28 }
 0x161   :  { %1054 = vst [vmem:[#allocation1 + $0x3] ss:$9 sm:$0xff] %v1964_v29 }
 0x162   :  { %1056 = vst [vmem:[#allocation1 + $0x4] ss:$9 sm:$0xff] %v1970_v30 }
 0x163   :  { %1058 = vst [vmem:[#allocation1 + $0x5] ss:$9 sm:$0xff] %v1976_v31 }
 0x164   :  { %1060 = vst [vmem:[#allocation1 + $0x6] ss:$9 sm:$0xff] %v1983_v32 }
 0x165   :  { %1062 = vst [vmem:[#allocation1 + $0x7] ss:$9 sm:$0xff] %v1989_v33 }
 0x16c   :  { %v2199_v62 = vld [vmem:[#allocation1] sm:$0xff] }
 0x16d   :  { %1090 = vst [vmem:[#allocation1] ss:$9 sm:$0xff] %v1861_v4 }
 0x16e   :  { %1092 = vst [vmem:[#allocation1 + $0x1] ss:$9 sm:$0xff] %v1866_v6 }
 0x16f   :  { %1094 = vst [vmem:[#allocation1 + $0x2] ss:$9 sm:$0xff] %v1871_v8 }
 0x170   :  { %1096 = vst [vmem:[#allocation1 + $0x3] ss:$9 sm:$0xff] %v1876_v10 }
 0x171   :  { %1098 = vst [vmem:[#allocation1 + $0x4] ss:$9 sm:$0xff] %v1881_v12 }
 0x172   :  { %1100 = vst [vmem:[#allocation1 + $0x5] ss:$9 sm:$0xff] %v1884_v13 }
 0x173   :  { %1102 = vst [vmem:[#allocation1 + $0x6] ss:$9 sm:$0xff] %v1887_v14 }
 0x174   :  { %1104 = vst [vmem:[#allocation1 + $0x7] ss:$9 sm:$0xff] %v1890_v15 }
 0x176   :  { %v741_v36 = vpop.permute.xlu1 %740 }
 0x177   :  { %1718 = vmatpush.xpose.msk.msra.mxu0 %vm96_vm0, %v741_v36 }
 0x17b   :  { %v1105_v63 = vld [vmem:[#allocation1] sm:$0xff] }
 0x17c   :  { %1108 = vst [vmem:[#allocation1] ss:$9 sm:$0xff] %v1900_v16  ;;  %1106 = vrot.lane.b32.xlu2 %v1105_v63, %s1816_s14 }
 0x17d   :  { %1110 = vst [vmem:[#allocation1 + $0x1] ss:$9 sm:$0xff] %v1905_v17 }
 0x17e   :  { %1112 = vst [vmem:[#allocation1 + $0x2] ss:$9 sm:$0xff] %v1910_v18  ;;  %v723_v39 = vpop.permute.xlu1 %722 }
 0x17f   :  { %1114 = vst [vmem:[#allocation1 + $0x3] ss:$9 sm:$0xff] %v1915_v20  ;;  %1719 = vmatmul.msk.f32.vlgmr.msra.gmra.mxu0 %vm96_vm0, %v723_v39 }
 0x180   :  { %1116 = vst [vmem:[#allocation1 + $0x4] ss:$9 sm:$0xff] %v1921_v21 }
 0x181   :  { %1118 = vst [vmem:[#allocation1 + $0x5] ss:$9 sm:$0xff] %v1927_v22 }
 0x182   :  { %1120 = vst [vmem:[#allocation1 + $0x6] ss:$9 sm:$0xff] %v1933_v23 }
 0x183   :  { %1122 = vst [vmem:[#allocation1 + $0x7] ss:$9 sm:$0xff] %v1939_v24 }
 0x18a   :  { %v2218_v0 = vld [vmem:[#allocation1] sm:$0xff] }
 0x18b   :  { %1176 = vst [vmem:[#allocation1] ss:$9 sm:$0xff] %v1948_v25  ;;  %1124 = vrot.lane.b32.xlu0 %v2218_v0, %s1816_s14 }
 0x18c   :  { %1178 = vst [vmem:[#allocation1 + $0x1] ss:$9 sm:$0xff] %v1953_v26 }
 0x18d   :  { %1180 = vst [vmem:[#allocation1 + $0x2] ss:$9 sm:$0xff] %v1958_v28 }
 0x18e   :  { %1182 = vst [vmem:[#allocation1 + $0x3] ss:$9 sm:$0xff] %v1964_v29 }
 0x18f   :  { %1184 = vst [vmem:[#allocation1 + $0x4] ss:$9 sm:$0xff] %v1970_v30 }
 0x190   :  { %1186 = vst [vmem:[#allocation1 + $0x5] ss:$9 sm:$0xff] %v1976_v31 }
 0x191   :  { %1188 = vst [vmem:[#allocation1 + $0x6] ss:$9 sm:$0xff] %v1983_v32 }
 0x192   :  { %1190 = vst [vmem:[#allocation1 + $0x7] ss:$9 sm:$0xff] %v1989_v33 }
 0x199   :  { %v2228_v1 = vld [vmem:[#allocation1] sm:$0xff] }
 0x19a   :  { %1218 = vst [vmem:[#allocation1] ss:$9 sm:$0xff] %v1861_v4 }
 0x19b   :  { %1220 = vst [vmem:[#allocation1 + $0x1] ss:$9 sm:$0xff] %v1866_v6 }
 0x19c   :  { %1222 = vst [vmem:[#allocation1 + $0x2] ss:$9 sm:$0xff] %v1871_v8 }
 0x19d   :  { %1224 = vst [vmem:[#allocation1 + $0x3] ss:$9 sm:$0xff] %v1876_v10 }
 0x19e   :  { %1226 = vst [vmem:[#allocation1 + $0x4] ss:$9 sm:$0xff] %v1881_v12 }
 0x19f   :  { %1228 = vst [vmem:[#allocation1 + $0x5] ss:$9 sm:$0xff] %v1884_v13 }
 0x1a0   :  { %1230 = vst [vmem:[#allocation1 + $0x6] ss:$9 sm:$0xff] %v1887_v14 }
 0x1a1   :  { %1232 = vst [vmem:[#allocation1 + $0x7] ss:$9 sm:$0xff] %v1890_v15 }
 0x1a8   :  { %v2238_v2 = vld [vmem:[#allocation1] sm:$0xff] }
 0x1a9   :  { %1236 = vst [vmem:[#allocation1] ss:$9 sm:$0xff] %v1900_v16  ;;  %1234 = vrot.lane.b32.xlu0 %v2238_v2, %s1817_s15 }
 0x1aa   :  { %1238 = vst [vmem:[#allocation1 + $0x1] ss:$9 sm:$0xff] %v1905_v17 }
 0x1ab   :  { %1240 = vst [vmem:[#allocation1 + $0x2] ss:$9 sm:$0xff] %v1910_v18 }
 0x1ac   :  { %1242 = vst [vmem:[#allocation1 + $0x3] ss:$9 sm:$0xff] %v1915_v20 }
 0x1ad   :  { %1244 = vst [vmem:[#allocation1 + $0x4] ss:$9 sm:$0xff] %v1921_v21 }
 0x1ae   :  { %1246 = vst [vmem:[#allocation1 + $0x5] ss:$9 sm:$0xff] %v1927_v22 }
 0x1af   :  { %1248 = vst [vmem:[#allocation1 + $0x6] ss:$9 sm:$0xff] %v1933_v23 }
 0x1b0   :  { %1250 = vst [vmem:[#allocation1 + $0x7] ss:$9 sm:$0xff] %v1939_v24 }
 0x1b7   :  { %v1251_v3 = vld [vmem:[#allocation1] sm:$0xff] }
 0x1b8   :  { %1252 = vrot.lane.b32.xlu1 %v1251_v3, %s1817_s15  ;;  %1304 = vst [vmem:[#allocation1] ss:$9 sm:$0xff] %v1948_v25 }
 0x1b9   :  { %1306 = vst [vmem:[#allocation1 + $0x1] ss:$9 sm:$0xff] %v1953_v26 }
 0x1ba   :  { %1308 = vst [vmem:[#allocation1 + $0x2] ss:$9 sm:$0xff] %v1958_v28 }
 0x1bb   :  { %1310 = vst [vmem:[#allocation1 + $0x3] ss:$9 sm:$0xff] %v1964_v29 }
 0x1bc   :  { %1312 = vst [vmem:[#allocation1 + $0x4] ss:$9 sm:$0xff] %v1970_v30 }
 0x1bd   :  { %1314 = vst [vmem:[#allocation1 + $0x5] ss:$9 sm:$0xff] %v1976_v31 }
 0x1be   :  { %1316 = vst [vmem:[#allocation1 + $0x6] ss:$9 sm:$0xff] %v1983_v32 }
 0x1bf   :  { %1318 = vst [vmem:[#allocation1 + $0x7] ss:$9 sm:$0xff] %v1989_v33 }
 0x1c6   :  { %v2257_v5 = vld [vmem:[#allocation1] sm:$0xff] }
 0x1c7   :  { %1346 = vst [vmem:[#allocation1] ss:$9 sm:$0xff] %v1861_v4 }
 0x1c8   :  { %1348 = vst [vmem:[#allocation1 + $0x1] ss:$9 sm:$0xff] %v1866_v6 }
 0x1c9   :  { %1350 = vst [vmem:[#allocation1 + $0x2] ss:$9 sm:$0xff] %v1871_v8 }
 0x1ca   :  { %1352 = vst [vmem:[#allocation1 + $0x3] ss:$9 sm:$0xff] %v1876_v10 }
 0x1cb   :  { %1354 = vst [vmem:[#allocation1 + $0x4] ss:$9 sm:$0xff] %v1881_v12 }
 0x1cc   :  { %1356 = vst [vmem:[#allocation1 + $0x5] ss:$9 sm:$0xff] %v1884_v13 }
 0x1cd   :  { %1358 = vst [vmem:[#allocation1 + $0x6] ss:$9 sm:$0xff] %v1887_v14 }
 0x1ce   :  { %1360 = vst [vmem:[#allocation1 + $0x7] ss:$9 sm:$0xff] %v1890_v15 }
 0x1d5   :  { %v2267_v7 = vld [vmem:[#allocation1] sm:$0xff] }
 0x1d6   :  { %1364 = vst [vmem:[#allocation1] ss:$9 sm:$0xff] %v1900_v16  ;;  %1362 = vrot.lane.b32.xlu0 %v2267_v7, %s1818_s16 }
 0x1d7   :  { %1366 = vst [vmem:[#allocation1 + $0x1] ss:$9 sm:$0xff] %v1905_v17 }
 0x1d8   :  { %1368 = vst [vmem:[#allocation1 + $0x2] ss:$9 sm:$0xff] %v1910_v18 }
 0x1d9   :  { %1370 = vst [vmem:[#allocation1 + $0x3] ss:$9 sm:$0xff] %v1915_v20 }
 0x1da   :  { %1372 = vst [vmem:[#allocation1 + $0x4] ss:$9 sm:$0xff] %v1921_v21 }
 0x1db   :  { %1374 = vst [vmem:[#allocation1 + $0x5] ss:$9 sm:$0xff] %v1927_v22 }
 0x1dc   :  { %1376 = vst [vmem:[#allocation1 + $0x6] ss:$9 sm:$0xff] %v1933_v23 }
 0x1dd   :  { %1378 = vst [vmem:[#allocation1 + $0x7] ss:$9 sm:$0xff] %v1939_v24 }
 0x1de   :  { %296 = vrot.lane.b32.xlu0 %v2021_v37, %s1809_s2 }
 0x1e4   :  { %v1379_v27 = vld [vmem:[#allocation1] sm:$0xff] }
 0x1e5   :  { %1380 = vrot.lane.b32.xlu1 %v1379_v27, %s1818_s16  ;;  %1432 = vst [vmem:[#allocation1] ss:$9 sm:$0xff] %v1948_v25 }
 0x1e6   :  { %1434 = vst [vmem:[#allocation1 + $0x1] ss:$9 sm:$0xff] %v1953_v26 }
 0x1e7   :  { %1436 = vst [vmem:[#allocation1 + $0x2] ss:$9 sm:$0xff] %v1958_v28 }
 0x1e8   :  { %1438 = vst [vmem:[#allocation1 + $0x3] ss:$9 sm:$0xff] %v1964_v29 }
 0x1e9   :  { %1440 = vst [vmem:[#allocation1 + $0x4] ss:$9 sm:$0xff] %v1970_v30 }
 0x1ea   :  { %1442 = vst [vmem:[#allocation1 + $0x5] ss:$9 sm:$0xff] %v1976_v31 }
 0x1eb   :  { %1444 = vst [vmem:[#allocation1 + $0x6] ss:$9 sm:$0xff] %v1983_v32 }
 0x1ec   :  { %1446 = vst [vmem:[#allocation1 + $0x7] ss:$9 sm:$0xff] %v1989_v33 }
 0x1f3   :  { %v2292_v38 = vld [vmem:[#allocation1] sm:$0xff] }
 0x1f4   :  { %1474 = vst [vmem:[#allocation1] ss:$9 sm:$0xff] %v1861_v4 }
 0x1f5   :  { %1476 = vst [vmem:[#allocation1 + $0x1] ss:$9 sm:$0xff] %v1866_v6 }
 0x1f6   :  { %1478 = vst [vmem:[#allocation1 + $0x2] ss:$9 sm:$0xff] %v1871_v8  ;;  %v2337_v8 = vpop.f32.mrf.mxu0 }
 0x1f7   :  { %1480 = vst [vmem:[#allocation1 + $0x3] ss:$9 sm:$0xff] %v1876_v10  ;;  %v510_v10 = vsel %vm96_vm0, %v2337_v8, -inf }
 0x1f8   :  { %1482 = vst [vmem:[#allocation1 + $0x4] ss:$9 sm:$0xff] %v1881_v12  ;;  %v2341_v12 = vpop.f32.mrf.mxu2 }
 0x1f9   :  { %1484 = vst [vmem:[#allocation1 + $0x5] ss:$9 sm:$0xff] %v1884_v13  ;;  %v254_v13 = vsel %vm96_vm0, %v2341_v12, -inf }
 0x1fa   :  { %1486 = vst [vmem:[#allocation1 + $0x6] ss:$9 sm:$0xff] %v1887_v14  ;;  %v613_v14 = vpop.permute.xlu2 %612 }
 0x1fb   :  { %1488 = vst [vmem:[#allocation1 + $0x7] ss:$9 sm:$0xff] %v1890_v15 }
 0x202   :  { %v1489_v4 = vld [vmem:[#allocation1] sm:$0xff]  ;;  %v595_v15 = vpop.permute.xlu2 %594 }
 0x203   :  { %1490 = vrot.lane.b32.xlu1 %v1489_v4, %s1819_s17  ;;  %1492 = vst [vmem:[#allocation1] ss:$9 sm:$0xff] %v1900_v16 }
 0x204   :  { %1494 = vst [vmem:[#allocation1 + $0x1] ss:$9 sm:$0xff] %v1905_v17  ;;  %v339_v17 = vpop.permute.xlu0 %338 }
 0x205   :  { %1496 = vst [vmem:[#allocation1 + $0x2] ss:$9 sm:$0xff] %v1910_v18  ;;  %v851_v18 = vpop.permute.xlu1 %850 }
 0x206   :  { %1498 = vst [vmem:[#allocation1 + $0x3] ss:$9 sm:$0xff] %v1915_v20 }
 0x207   :  { %1500 = vst [vmem:[#allocation1 + $0x4] ss:$9 sm:$0xff] %v1921_v21 }
 0x208   :  { %1502 = vst [vmem:[#allocation1 + $0x5] ss:$9 sm:$0xff] %v1927_v22 }
 0x209   :  { %1504 = vst [vmem:[#allocation1 + $0x6] ss:$9 sm:$0xff] %v1933_v23 }
 0x20a   :  { %1506 = vst [vmem:[#allocation1 + $0x7] ss:$9 sm:$0xff] %v1939_v24  ;;  %v869_v16 = vpop.permute.xlu2 %868 }
 0x20b   :  { %552 = vrot.lane.b32.xlu1 %v2080_v45, %s1811_s9  ;;  %v763_v45 = vpop.f32.mrf.mxu0 }
 0x20c   :  { %v129_v20 = vpop.xlane.xlu0 %128  ;;  %v766_v46 = vsel %vm96_vm0, %v763_v45, -inf }
 0x20d   :  { %1763 = vrcp.f32 %v129_v20  ;;  %vm135_vm2 = vweird.f32 %v129_v20  ;;  %767 = vmax.xlane.f32.xlu0 %v766_v46 }
 0x211   :  { %v1507_v6 = vld [vmem:[#allocation1] sm:$0xff] }
 0x212   :  { %1508 = vrot.lane.b32.xlu2 %v1507_v6, %s1819_s17  ;;  %1560 = vst [vmem:[#allocation1] ss:$9 sm:$0xff] %v1948_v25  ;;  %v979_v21 = vpop.permute.xlu2 %978 }
 0x213   :  { %1562 = vst [vmem:[#allocation1 + $0x1] ss:$9 sm:$0xff] %v1953_v26  ;;  %680 = vrot.lane.b32.xlu1 %v2109_v48, %s1812_s10  ;;  %v1764_v23 = vpop.eup %1763  ;;  %v141_v26 = vand.u32 2147483648, %v129_v20 }
 0x214   :  { %1564 = vst [vmem:[#allocation1 + $0x2] ss:$9 sm:$0xff] %v1958_v28  ;;  %v131_v24 = vmul.f32 %v1764_v23, %v129_v20  ;;  %vm136_vm1 = vweird.f32 %v1764_v23  ;;  %v997_v42 = vpop.permute.xlu0 %996 }
 0x215   :  { %1566 = vst [vmem:[#allocation1 + $0x3] ss:$9 sm:$0xff] %v1964_v29  ;;  %vm137_vm3 = vmor %vm135_vm2, %vm136_vm1  ;;  %1726 = vmatpush.xpose.msk.msrb.mxu0 %vm96_vm0, %v997_v42 }
 0x216   :  { %1568 = vst [vmem:[#allocation1 + $0x4] ss:$9 sm:$0xff] %v1970_v30  ;;  %v132_v25 = vsub.f32 1.0, %v131_v24  ;;  %v139_v30 = vand.u32 2147483647, %v129_v20 }
 0x217   :  { %1570 = vst [vmem:[#allocation1 + $0x5] ss:$9 sm:$0xff] %v1976_v31 }
 0x218   :  { %1572 = vst [vmem:[#allocation1 + $0x6] ss:$9 sm:$0xff] %v1983_v32  ;;  %v133_v29 = vmul.f32 %v1764_v23, %v132_v25  ;;  %vm140_vm4 = vcmp.eq.f32.partialorder %v139_v30, 8.507059e+37  ;;  %1727 = vmatmul.msk.f32.vlgmr.msrb.gmra.mxu0 %vm96_vm0, %v979_v21 }
 0x219   :  { %1574 = vst [vmem:[#allocation1 + $0x7] ss:$9 sm:$0xff] %v1989_v33  ;;  %v142_v33 = vor.u32 1.1754944e-38, %v141_v26 }
 0x21a   :  { %424 = vrot.lane.b32.xlu2 %v2048_v40, %s1810_s8  ;;  %v1107_v28 = vpop.permute.xlu2 %1106  ;;  %v134_v32 = vadd.f32 %v1764_v23, %v133_v29 }
 0x21c   :  { %v138_v37 = vsel %vm137_vm3, %v1764_v23, %v134_v32  ;;  %v1125_v47 = vpop.permute.xlu0 %1124 }
 0x21d   :  { %v143_v40 = vsel %vm140_vm4, %v142_v33, %v138_v37 }
 0x21e   :  { %v144_v41 = vmul.f32 %v2281_v34, %v143_v40 }
 0x220   :  { %145 = vst.msk [vmem:[%s2606_s4] sm:$0xff] %vm96_vm0, %v144_v41  ;;  %1701 = vmatmul.msk.f32.vlgmr.msra.gmra.mxu1 %vm96_vm0, %v144_v41 }
 0x221   :  { %1714 = vmatpush.xpose.msk.msra.mxu1 %vm96_vm0, %v613_v14 }
 0x224   :  { %v1235_v49 = vpop.permute.xlu0 %1234 }
 0x228   :  { %1707 = vmatmul.msk.f32.vlgmr.msrb.gmra.mxu1 %vm96_vm0, %v339_v17 }
 0x229   :  { %1722 = vmatpush.xpose.msk.msrb.mxu1 %vm96_vm0, %v869_v16 }
 0x22a   :  { %v1253_v22 = vpop.permute.xlu1 %1252 }
 0x22b   :  { %1734 = vmatpush.xpose.msk.msra.mxu0 %vm96_vm0, %v1253_v22 }
 0x22e   :  { %1735 = vmatmul.msk.f32.vlgmr.msra.gmra.mxu0 %vm96_vm0, %v1235_v49 }
 0x230   :  { %1715 = vmatmul.msk.f32.vlgmr.msra.gmra.mxu1 %vm96_vm0, %v595_v15 }
 0x231   :  { %1730 = vmatpush.xpose.msk.msra.mxu1 %vm96_vm0, %v1125_v47 }
 0x238   :  { %1723 = vmatmul.msk.f32.vlgmr.msrb.gmra.mxu1 %vm96_vm0, %v851_v18 }
 0x23d   :  { %511 = vmax.xlane.f32.xlu1 %v510_v10 }
 0x240   :  { %1731 = vmatmul.msk.f32.vlgmr.msra.gmra.mxu1 %vm96_vm0, %v1107_v28 }
 0x243   :  { %255 = vmax.xlane.f32.xlu2 %v254_v13 }
 0x248   :  { %v1363_v50 = vpop.permute.xlu0 %1362 }
 0x250   :  { %v297_v52 = vpop.permute.xlu0 %296 }
 0x251   :  { %317 = vmatpush.msra.mxu3 %v297_v52 }
 0x257   :  { %v1381_v31 = vpop.permute.xlu1 %1380 }
 0x258   :  { %1738 = vmatpush.xpose.msk.msrb.mxu1 %vm96_vm0, %v1381_v31 }
 0x25b   :  { %1739 = vmatmul.msk.f32.vlgmr.msrb.gmra.mxu1 %vm96_vm0, %v1363_v50 }
 0x26c   :  { %v1509_v43 = vpop.permute.xlu2 %1508 }
 0x26d   :  { %1742 = vmatpush.xpose.msk.msrb.mxu0 %vm96_vm0, %v1509_v43 }
 0x274   :  { %v425_v53 = vpop.permute.xlu2 %424 }
 0x275   :  { %v1491_v44 = vpop.permute.xlu1 %1490  ;;  %445 = vmatpush.msrb.mxu3 %v425_v53 }
 0x276   :  { %1743 = vmatmul.msk.f32.vlgmr.msrb.gmra.mxu0 %vm96_vm0, %v1491_v44 }
 0x27d   :  { %v553_v48 = vpop.permute.xlu1 %552 }
 0x27e   :  { %573 = vmatpush.msrb.mxu2 %v553_v48 }
 0x280   :  { %v768_v7 = vpop.xlane.xlu0 %767 }
 0x281   :  { %v769_v9 = vsub.f32 %v763_v45, %v768_v7 }
 0x283   :  { %v770_v11 = vmul.f32 1.442695, %v769_v9 }
 0x285   :  { %v2367_v51 = vpop.permute.xlu1 %680 }
 0x295   :  { %v2381_v27 = vpop.f32.mrf.mxu0 }
 0x296   :  { %v1022_v34 = vsel %vm96_vm0, %v2381_v27, -inf }
 0x297   :  { %1023 = vmax.xlane.f32.xlu1 %v1022_v34 }
 0x29d   :  { %v2379_v19 = vpop.f32.mrf.mxu1 }
 0x2a5   :  { %v2387_v36 = vpop.f32.mrf.mxu1 }
 0x2a6   :  { %v382_v16 = vsel %vm96_vm0, %v2387_v36, -inf }
 0x2ab   :  { %v2391_v4 = vpop.f32.mrf.mxu0 }
 0x2ac   :  { %v1278_v6 = vsel %vm96_vm0, %v2391_v4, -inf }
 0x2b0   :  { %v512_v54 = vpop.xlane.xlu1 %511 }
 0x2b1   :  { %v513_v55 = vsub.f32 %v2337_v8, %v512_v54  ;;  %v2395_v8 = vpop.f32.mrf.mxu1 }
 0x2b2   :  { %v638_v13 = vsel %vm96_vm0, %v2395_v8, -inf }
 0x2b3   :  { %v514_v57 = vmul.f32 1.442695, %v513_v55 }
 0x2b5   :  { %1765 = vpow2.f32 %v514_v57 }
 0x2b6   :  { %v256_v58 = vpop.xlane.xlu2 %255 }
 0x2b7   :  { %v257_v60 = vsub.f32 %v2341_v12, %v256_v58 }
 0x2b9   :  { %v258_v61 = vmul.f32 1.442695, %v257_v60  ;;  %v2403_v14 = vpop.f32.mrf.mxu1 }
 0x2ba   :  { %v894_v15 = vsel %vm96_vm0, %v2403_v14, -inf }
 0x2bb   :  { %v2371_v63 = vpop.eup %1765  ;;  %1767 = vpow2.f32 %v258_v61 }
 0x2bc   :  { %v516_v0 = vsel %vm96_vm0, %v2371_v63, 0.0  ;;  %1769 = vpow2.f32 %v770_v11 }
 0x2bd   :  { %517 = vadd.xlane.f32.xlu0 %v516_v0 }
 0x2c1   :  { %v2375_v2 = vpop.eup %1767  ;;  %v2409_v17 = vpop.f32.mrf.mxu1 }
 0x2c2   :  { %v260_v3 = vsel %vm96_vm0, %v2375_v2, 0.0  ;;  %v2385_v35 = vpop.eup %1769  ;;  %v1150_v18 = vsel %vm96_vm0, %v2409_v17, -inf }
 0x2c3   :  { %261 = vadd.xlane.f32.xlu2 %v260_v3  ;;  %v772_v39 = vsel %vm96_vm0, %v2385_v35, 0.0 }
 0x2c4   :  { %773 = vadd.xlane.f32.xlu1 %v772_v39 }
 0x2cb   :  { %1279 = vmax.xlane.f32.xlu2 %v1278_v6 }
 0x2d3   :  { %639 = vmax.xlane.f32.xlu2 %v638_v13 }
 0x2d8   :  { %v2438_v58 = vpop.f32.mrf.mxu1 }
 0x2db   :  { %895 = vmax.xlane.f32.xlu2 %v894_v15 }
 0x2f3   :  { %v2397_v10 = vpop.f32.mrf.mxu0  ;;  %1064 = vrot.lane.b32.xlu2 %v2199_v62, %s1815_s13 }
 0x2f4   :  { %v1534_v12 = vsel %vm96_vm0, %v2397_v10, -inf }
 0x2f5   :  { %1535 = vmax.xlane.f32.xlu0 %v1534_v12 }
 0x2fd   :  { %383 = vmax.xlane.f32.xlu0 %v382_v16 }
 0x305   :  { %1151 = vmax.xlane.f32.xlu0 %v1150_v18 }
 0x30a   :  { %v1024_v47 = vpop.xlane.xlu1 %1023 }
 0x30b   :  { %v1025_v48 = vsub.f32 %v2381_v27, %v1024_v47 }
 0x30d   :  { %v1026_v49 = vmul.f32 1.442695, %v1025_v48 }
 0x319   :  { %936 = vrot.lane.b32.xlu0 %v2170_v59, %s1814_s12 }
 0x321   :  { %1192 = vrot.lane.b32.xlu0 %v2228_v1, %s1816_s14 }
 0x330   :  { %v518_v20 = vpop.xlane.xlu0 %517 }
 0x331   :  { %1771 = vrcp.f32 %v518_v20  ;;  %v530_v24 = vand.u32 2147483648, %v518_v20  ;;  %vm524_vm5 = vweird.f32 %v518_v20  ;;  %v528_v26 = vand.u32 2147483647, %v518_v20 }
 0x333   :  { %v531_v62 = vor.u32 1.1754944e-38, %v530_v24  ;;  %vm529_vm8 = vcmp.eq.f32.partialorder %v528_v26, 8.507059e+37 }
 0x336   :  { %v262_v21 = vpop.xlane.xlu2 %261 }
 0x337   :  { %v1772_v22 = vpop.eup %1771  ;;  %1773 = vrcp.f32 %v262_v21  ;;  %vm268_vm9 = vweird.f32 %v262_v21  ;;  %v274_v31 = vand.u32 2147483648, %v262_v21  ;;  %v272_v1 = vand.u32 2147483647, %v262_v21  ;;  %v774_v50 = vpop.xlane.xlu1 %773 }
 0x338   :  { %v520_v23 = vmul.f32 %v1772_v22, %v518_v20  ;;  %vm525_vm6 = vweird.f32 %v1772_v22  ;;  %1775 = vpow2.f32 %v1026_v49  ;;  %v786_v0 = vand.u32 2147483648, %v774_v50 }
 0x339   :  { %vm526_vm7 = vmor %vm524_vm5, %vm525_vm6  ;;  %v275_v42 = vor.u32 1.1754944e-38, %v274_v31  ;;  %vm273_vm12 = vcmp.eq.f32.partialorder %v272_v1, 8.507059e+37  ;;  %1777 = vrcp.f32 %v774_v50  ;;  %v784_v3 = vand.u32 2147483647, %v774_v50 }
 0x33a   :  { %v521_v25 = vsub.f32 1.0, %v520_v23  ;;  %vm780_vm14 = vweird.f32 %v774_v50  ;;  %v787_v39 = vor.u32 1.1754944e-38, %v786_v0 }
 0x33b   :  { %vm785_vm1 = vcmp.eq.f32.partialorder %v784_v3, 8.507059e+37 }
 0x33c   :  { %v522_v28 = vmul.f32 %v1772_v22, %v521_v25 }
 0x33d   :  { %v1774_v29 = vpop.eup %1773 }
 0x33e   :  { %v264_v30 = vmul.f32 %v1774_v29, %v262_v21  ;;  %v523_v59 = vadd.f32 %v1772_v22, %v522_v28  ;;  %vm269_vm10 = vweird.f32 %v1774_v29  ;;  %v2433_v52 = vpop.eup %1775  ;;  %v1280_v54 = vpop.xlane.xlu2 %1279 }
 0x33f   :  { %vm270_vm11 = vmor %vm268_vm9, %vm269_vm10  ;;  %v1028_v53 = vsel %vm96_vm0, %v2433_v52, 0.0  ;;  %v1281_v55 = vsub.f32 %v2391_v4, %v1280_v54  ;;  %v1778_v57 = vpop.eup %1777 }
 0x340   :  { %v265_v32 = vsub.f32 1.0, %v264_v30  ;;  %v527_v33 = vsel %vm526_vm7, %v1772_v22, %v523_v59  ;;  %1029 = vadd.xlane.f32.xlu1 %v1028_v53  ;;  %vm781_vm13 = vweird.f32 %v1778_v57 }
 0x341   :  { %v532_v37 = vsel %vm529_vm8, %v531_v62, %v527_v33  ;;  %v1282_v60 = vmul.f32 1.442695, %v1281_v55  ;;  %vm782_vm15 = vmor %vm780_vm14, %vm781_vm13 }
 0x342   :  { %v266_v40 = vmul.f32 %v1774_v29, %v265_v32  ;;  %v533_v41 = vmul.f32 %v2371_v63, %v532_v37  ;;  %v1406_v63 = vsel %vm96_vm0, %v2438_v58, -inf }
 0x343   :  { %1779 = vpow2.f32 %v1282_v60 }
 0x344   :  { %v267_v43 = vadd.f32 %v1774_v29, %v266_v40  ;;  %1712 = vst.msk [vmem:[%s2606_s4 + $0x18] sm:$0xff] %vm96_vm0, %v533_v41  ;;  %1713 = vmatmul.msk.f32.vlgmr.msrb.gmra.mxu2 %vm96_vm0, %v533_v41 }
 0x346   :  { %v271_v44 = vsel %vm270_vm11, %v1774_v29, %v267_v43  ;;  %v640_v7 = vpop.xlane.xlu2 %639 }
 0x347   :  { %v276_v45 = vsel %vm273_vm12, %v275_v42, %v271_v44  ;;  %v641_v27 = vsub.f32 %v2395_v8, %v640_v7 }
 0x348   :  { %v277_v46 = vmul.f32 %v2375_v2, %v276_v45  ;;  %1407 = vmax.xlane.f32.xlu1 %v1406_v63 }
 0x349   :  { %v2444_v4 = vpop.eup %1779  ;;  %v642_v12 = vmul.f32 1.442695, %v641_v27 }
 0x34a   :  { %1704 = vst.msk [vmem:[%s2606_s4 + $0x8] sm:$0xff] %vm96_vm0, %v277_v46  ;;  %1705 = vmatmul.msk.f32.vlgmr.msra.gmra.mxu3 %vm96_vm0, %v277_v46  ;;  %v1284_v16 = vsel %vm96_vm0, %v2444_v4, 0.0 }
 0x34b   :  { %701 = vmatpush.msra.mxu3 %v2367_v51  ;;  %v776_v51 = vmul.f32 %v1778_v57, %v774_v50  ;;  %1781 = vpow2.f32 %v642_v12  ;;  %1285 = vadd.xlane.f32.xlu2 %v1284_v16 }
 0x34d   :  { %v777_v61 = vsub.f32 1.0, %v776_v51 }
 0x34e   :  { %v896_v8 = vpop.xlane.xlu2 %895 }
 0x34f   :  { %v778_v2 = vmul.f32 %v1778_v57, %v777_v61  ;;  %v897_v20 = vsub.f32 %v2403_v14, %v896_v8 }
 0x351   :  { %v779_v11 = vadd.f32 %v1778_v57, %v778_v2  ;;  %v2457_v21 = vpop.eup %1781  ;;  %v898_v22 = vmul.f32 1.442695, %v897_v20 }
 0x352   :  { %v644_v24 = vsel %vm96_vm0, %v2457_v21, 0.0 }
 0x353   :  { %v783_v6 = vsel %vm782_vm15, %v1778_v57, %v779_v11  ;;  %645 = vadd.xlane.f32.xlu2 %v644_v24 }
 0x354   :  { %v788_v15 = vsel %vm785_vm1, %v787_v39, %v783_v6 }
 0x355   :  { %v2449_v18 = vmul.f32 %v2385_v35, %v788_v15 }
 0x356   :  { %v2485_v37 = vpop.permute.xlu2 %1064 }
 0x357   :  { %1720 = vst.msk [vmem:[%s2606_s4 + $0x28] sm:$0xff] %vm96_vm0, %v2449_v18 }
 0x361   :  { %808 = vrot.lane.b32.xlu1 %v2142_v56, %s1813_s11 }
 0x368   :  { %v1536_v9 = vpop.xlane.xlu0 %1535 }
 0x369   :  { %v1537_v34 = vsub.f32 %v2397_v10, %v1536_v9 }
 0x36b   :  { %v1538_v13 = vmul.f32 1.442695, %v1537_v34 }
 0x36d   :  { %1783 = vpow2.f32 %v1538_v13 }
 0x36e   :  { %1785 = vpow2.f32 %v898_v22 }
 0x370   :  { %v384_v10 = vpop.xlane.xlu0 %383 }
 0x371   :  { %v385_v59 = vsub.f32 %v2387_v36, %v384_v10 }
 0x373   :  { %v2459_v23 = vpop.eup %1783 }
 0x374   :  { %v1540_v35 = vsel %vm96_vm0, %v2459_v23, 0.0  ;;  %v2466_v26 = vpop.eup %1785 }
 0x375   :  { %1541 = vadd.xlane.f32.xlu0 %v1540_v35  ;;  %v900_v29 = vsel %vm96_vm0, %v2466_v26, 0.0 }
 0x376   :  { %901 = vadd.xlane.f32.xlu2 %v900_v29 }
 0x378   :  { %v1152_v14 = vpop.xlane.xlu0 %1151 }
 0x379   :  { %v1153_v25 = vsub.f32 %v2409_v17, %v1152_v14  ;;  %v386_v17 = vmul.f32 1.442695, %v385_v59 }
 0x37b   :  { %v1154_v28 = vmul.f32 1.442695, %v1153_v25 }
 0x37d   :  { %1787 = vpow2.f32 %v1154_v28 }
 0x37e   :  { %1789 = vpow2.f32 %v386_v17 }
 0x383   :  { %v2472_v62 = vpop.eup %1787 }
 0x384   :  { %v1156_v30 = vsel %vm96_vm0, %v2472_v62, 0.0  ;;  %v2479_v31 = vpop.eup %1789 }
 0x385   :  { %1157 = vadd.xlane.f32.xlu0 %v1156_v30  ;;  %v388_v32 = vsel %vm96_vm0, %v2479_v31, 0.0 }
 0x38b   :  { %389 = vadd.xlane.f32.xlu1 %v388_v32  ;;  %v2483_v36 = vpop.permute.xlu0 %936 }
 0x393   :  { %v2488_v48 = vpop.permute.xlu0 %1192 }
 0x399   :  { %1448 = vrot.lane.b32.xlu0 %v2292_v38, %s1818_s16 }
 0x3b3   :  { %v1030_v33 = vpop.xlane.xlu1 %1029 }
 0x3b4   :  { %1791 = vrcp.f32 %v1030_v33  ;;  %v1042_v44 = vand.u32 2147483648, %v1030_v33  ;;  %v1040_v47 = vand.u32 2147483647, %v1030_v33  ;;  %vm1036_vm3 = vweird.f32 %v1030_v33 }
 0x3b6   :  { %v1043_v53 = vor.u32 1.1754944e-38, %v1042_v44  ;;  %vm1041_vm5 = vcmp.eq.f32.partialorder %v1040_v47, 8.507059e+37 }
 0x3ba   :  { %v1792_v38 = vpop.eup %1791 }
 0x3bb   :  { %v1032_v40 = vmul.f32 %v1792_v38, %v1030_v33  ;;  %v1408_v41 = vpop.xlane.xlu1 %1407  ;;  %vm1037_vm2 = vweird.f32 %v1792_v38 }
 0x3bc   :  { %v1409_v42 = vsub.f32 %v2438_v58, %v1408_v41  ;;  %vm1038_vm4 = vmor %vm1036_vm3, %vm1037_vm2 }
 0x3bd   :  { %v1033_v43 = vsub.f32 1.0, %v1032_v40 }
 0x3be   :  { %v1410_v45 = vmul.f32 1.442695, %v1409_v42  ;;  %v1286_v49 = vpop.xlane.xlu2 %1285 }
 0x3bf   :  { %v1034_v46 = vmul.f32 %v1792_v38, %v1033_v43  ;;  %v1298_v3 = vand.u32 2147483648, %v1286_v49  ;;  %v1296_v9 = vand.u32 2147483647, %v1286_v49  ;;  %vm1292_vm7 = vweird.f32 %v1286_v49 }
 0x3c0   :  { %1793 = vpow2.f32 %v1410_v45 }
 0x3c1   :  { %v1035_v50 = vadd.f32 %v1792_v38, %v1034_v46  ;;  %1795 = vrcp.f32 %v1286_v49  ;;  %v1299_v27 = vor.u32 1.1754944e-38, %v1298_v3  ;;  %vm1297_vm9 = vcmp.eq.f32.partialorder %v1296_v9, 8.507059e+37 }
 0x3c3   :  { %v1039_v54 = vsel %vm1038_vm4, %v1792_v38, %v1035_v50 }
 0x3c4   :  { %v1044_v55 = vsel %vm1041_vm5, %v1043_v53, %v1039_v54 }
 0x3c5   :  { %v2495_v60 = vmul.f32 %v2433_v52, %v1044_v55 }
 0x3c6   :  { %v2490_v57 = vpop.eup %1793  ;;  %v646_v63 = vpop.xlane.xlu2 %645 }
 0x3c7   :  { %v575_v1 = vpop.f32.mrf.mxu2  ;;  %v1796_v58 = vpop.eup %1795  ;;  %v1412_v51 = vsel %vm96_vm0, %v2490_v57, 0.0  ;;  %1797 = vrcp.f32 %v646_v63  ;;  %1728 = vst.msk [vmem:[%s2606_s4 + $0x38] sm:$0xff] %vm96_vm0, %v2495_v60  ;;  %v656_v8 = vand.u32 2147483647, %v646_v63  ;;  %v658_v10 = vand.u32 2147483648, %v646_v63 }
 0x3c8   :  { %v1288_v61 = vmul.f32 %v1796_v58, %v1286_v49  ;;  %1413 = vadd.xlane.f32.xlu1 %v1412_v51  ;;  %vm1293_vm6 = vweird.f32 %v1796_v58  ;;  %vm652_vm12 = vweird.f32 %v646_v63 }
 0x3c9   :  { %vm1294_vm8 = vmor %vm1292_vm7, %vm1293_vm6  ;;  %vm657_vm15 = vcmp.eq.f32.partialorder %v656_v8, 8.507059e+37 }
 0x3ca   :  { %v1289_v2 = vsub.f32 1.0, %v1288_v61 }
 0x3cc   :  { %v1290_v7 = vmul.f32 %v1796_v58, %v1289_v2 }
 0x3cd   :  { %v319_v56 = vpop.f32.mrf.mxu3  ;;  %v1798_v52 = vpop.eup %1797 }
 0x3ce   :  { %1603 = vrot.lane.b32.xlu0 %v319_v56, %s1820_s25  ;;  %v1291_v11 = vadd.f32 %v1796_v58, %v1290_v7  ;;  %v648_v6 = vmul.f32 %v1798_v52, %v646_v63  ;;  %vm653_vm10 = vweird.f32 %v1798_v52 }
 0x3cf   :  { %vm654_vm13 = vmor %vm652_vm12, %vm653_vm10 }
 0x3d0   :  { %v1295_v39 = vsel %vm1294_vm8, %v1796_v58, %v1291_v11  ;;  %v649_v16 = vsub.f32 1.0, %v648_v6 }
 0x3d1   :  { %v1300_v13 = vsel %vm1297_vm9, %v1299_v27, %v1295_v39 }
 0x3d2   :  { %v650_v24 = vmul.f32 %v1798_v52, %v649_v16  ;;  %v2503_v14 = vmul.f32 %v2444_v4, %v1300_v13  ;;  %v659_v4 = vor.u32 1.1754944e-38, %v658_v10 }
 0x3d3   :  { %v809_v22 = vpop.permute.xlu1 %808 }
 0x3d4   :  { %829 = vmatpush.msra.mxu2 %v809_v22  ;;  %v651_v29 = vadd.f32 %v1798_v52, %v650_v24  ;;  %1736 = vst.msk [vmem:[%s2606_s4 + $0x48] sm:$0xff] %vm96_vm0, %v2503_v14 }
 0x3d5   :  { %1721 = vmatmul.msk.f32.vlgmr.msra.gmra.mxu2 %vm96_vm0, %v2449_v18 }
 0x3d6   :  { %1611 = vrot.lane.b32.xlu0 %v575_v1, %s1821_s26  ;;  %1085 = vmatpush.msrb.mxu2 %v2485_v37  ;;  %v655_v17 = vsel %vm654_vm13, %v1798_v52, %v651_v29 }
 0x3d7   :  { %v660_v56 = vsel %vm657_vm15, %v659_v4, %v655_v17 }
 0x3d8   :  { %v661_v43 = vmul.f32 %v2457_v21, %v660_v56 }
 0x3da   :  { %1716 = vst.msk [vmem:[%s2606_s4 + $0x20] sm:$0xff] %vm96_vm0, %v661_v43 }
 0x3dd   :  { %1729 = vmatmul.msk.f32.vlgmr.msrb.gmra.mxu2 %vm96_vm0, %v2495_v60 }
 0x3e1   :  { %1320 = vrot.lane.b32.xlu1 %v2257_v5, %s1817_s15 }
 0x3e8   :  { %v1542_v0 = vpop.xlane.xlu0 %1541 }
 0x3e9   :  { %1799 = vrcp.f32 %v1542_v0  ;;  %v902_v12 = vpop.xlane.xlu2 %901  ;;  %v1554_v35 = vand.u32 2147483648, %v1542_v0  ;;  %v1552_v28 = vand.u32 2147483647, %v1542_v0  ;;  %vm1548_vm14 = vweird.f32 %v1542_v0 }
 0x3ea   :  { %1801 = vrcp.f32 %v902_v12  ;;  %v912_v40 = vand.u32 2147483647, %v902_v12  ;;  %v914_v41 = vand.u32 2147483648, %v902_v12  ;;  %vm908_vm4 = vweird.f32 %v902_v12 }
 0x3eb   :  { %v1555_v32 = vor.u32 1.1754944e-38, %v1554_v35  ;;  %vm1553_vm2 = vcmp.eq.f32.partialorder %v1552_v28, 8.507059e+37 }
 0x3ec   :  { %v915_v46 = vor.u32 1.1754944e-38, %v914_v41  ;;  %vm913_vm6 = vcmp.eq.f32.partialorder %v912_v40, 8.507059e+37 }
 0x3ef   :  { %v1800_v34 = vpop.eup %1799 }
 0x3f0   :  { %v1544_v15 = vmul.f32 %v1800_v34, %v1542_v0  ;;  %vm1549_vm11 = vweird.f32 %v1800_v34  ;;  %v1802_v30 = vpop.eup %1801 }
 0x3f1   :  { %vm1550_vm1 = vmor %vm1548_vm14, %vm1549_vm11  ;;  %v904_v18 = vmul.f32 %v1802_v30, %v902_v12  ;;  %vm909_vm3 = vweird.f32 %v1802_v30 }
 0x3f2   :  { %v1545_v20 = vsub.f32 1.0, %v1544_v15  ;;  %vm910_vm5 = vmor %vm908_vm4, %vm909_vm3  ;;  %vm1647_vm4 = vcmask 130048  }
 0x3f3   :  { %v905_v38 = vsub.f32 1.0, %v904_v18 }
 0x3f4   :  { %v1546_v25 = vmul.f32 %v1800_v34, %v1545_v20 }
 0x3f5   :  { %v906_v42 = vmul.f32 %v1802_v30, %v905_v38 }
 0x3f6   :  { %v1547_v59 = vadd.f32 %v1800_v34, %v1546_v25 }
 0x3f7   :  { %v907_v45 = vadd.f32 %v1802_v30, %v906_v42 }
 0x3f8   :  { %v1551_v1 = vsel %vm1550_vm1, %v1800_v34, %v1547_v59  ;;  %v1158_v33 = vpop.xlane.xlu0 %1157 }
 0x3f9   :  { %v1556_v37 = vsel %vm1553_vm2, %v1555_v32, %v1551_v1  ;;  %1803 = vrcp.f32 %v1158_v33  ;;  %v1170_v53 = vand.u32 2147483648, %v1158_v33  ;;  %v1168_v58 = vand.u32 2147483647, %v1158_v33 }
 0x3fa   :  { %v2515_v44 = vmul.f32 %v2459_v23, %v1556_v37  ;;  %v911_v23 = vsel %vm910_vm5, %v1802_v30, %v907_v45  ;;  %vm1164_vm8 = vweird.f32 %v1158_v33  ;;  %vm1649_vm5 = vcmask 195584  }
 0x3fb   :  { %v916_v47 = vsel %vm913_vm6, %v915_v46, %v911_v23  ;;  %v1171_v60 = vor.u32 1.1754944e-38, %v1170_v53  ;;  %vm1169_vm10 = vcmp.eq.f32.partialorder %v1168_v58, 8.507059e+37  ;;  %vm1651_vm6 = vcmask 261120  }
 0x3fc   :  { %1744 = vst.msk [vmem:[%s2606_s4 + $0x58] sm:$0xff] %vm96_vm0, %v2515_v44  ;;  %v917_v54 = vmul.f32 %v2466_v26, %v916_v47  ;;  %v1575_v26 = vld [vmem:[#allocation1] sm:$0xff] }
 0x3fd   :  { %1576 = vrot.lane.b32.xlu2 %v1575_v26, %s1819_s17 }
 0x3fe   :  { %1724 = vst.msk [vmem:[%s2606_s4 + $0x30] sm:$0xff] %vm96_vm0, %v917_v54  ;;  %v390_v0 = vpop.xlane.xlu1 %389 }
 0x3ff   :  { %v1804_v21 = vpop.eup %1803  ;;  %1805 = vrcp.f32 %v390_v0  ;;  %v402_v9 = vand.u32 2147483648, %v390_v0  ;;  %v400_v52 = vand.u32 2147483647, %v390_v0  ;;  %vm396_vm12 = vweird.f32 %v390_v0 }
 0x400   :  { %v1160_v49 = vmul.f32 %v1804_v21, %v1158_v33  ;;  %vm1165_vm7 = vweird.f32 %v1804_v21 }
 0x401   :  { %vm1166_vm9 = vmor %vm1164_vm8, %vm1165_vm7  ;;  %vm401_vm14 = vcmp.eq.f32.partialorder %v400_v52, 8.507059e+37  ;;  %vm1653_vm7 = vcmask 326656   ;;  %vm1655_vm8 = vcmask 392192  }
 0x402   :  { %v1161_v50 = vsub.f32 1.0, %v1160_v49 }
 0x404   :  { %v1162_v55 = vmul.f32 %v1804_v21, %v1161_v50 }
 0x405   :  { %v1806_v2 = vpop.eup %1805 }
 0x406   :  { %v1163_v51 = vadd.f32 %v1804_v21, %v1162_v55  ;;  %v392_v3 = vmul.f32 %v1806_v2, %v390_v0  ;;  %vm397_vm11 = vweird.f32 %v1806_v2 }
 0x407   :  { %vm398_vm13 = vmor %vm396_vm12, %vm397_vm11  ;;  %vm1661_vm11 = vcmask 588800   ;;  %vm1665_vm12 = vcmask 719872  }
 0x408   :  { %v1167_v61 = vsel %vm1166_vm9, %v1804_v21, %v1163_v51  ;;  %v393_v7 = vsub.f32 1.0, %v392_v3  ;;  %vm1657_vm9 = vcmask 457728  }
 0x409   :  { %v1172_v63 = vsel %vm1169_vm10, %v1171_v60, %v1167_v61  ;;  %vm1659_vm10 = vcmask 523264  }
 0x40a   :  { %v1173_v5 = vmul.f32 %v2472_v62, %v1172_v63  ;;  %v394_v11 = vmul.f32 %v1806_v2, %v393_v7  ;;  %v403_v62 = vor.u32 1.1754944e-38, %v402_v9 }
 0x40b   :  { %v1449_v12 = vpop.permute.xlu0 %1448 }
 0x40c   :  { %1732 = vst.msk [vmem:[%s2606_s4 + $0x40] sm:$0xff] %vm96_vm0, %v1173_v5  ;;  %v395_v27 = vadd.f32 %v1806_v2, %v394_v11 }
 0x40e   :  { %v399_v34 = vsel %vm398_vm13, %v1806_v2, %v395_v27  ;;  %vm1682_vm13 = vcmask 778240  }
 0x40f   :  { %v404_v39 = vsel %vm401_vm14, %v403_v62, %v399_v34 }
 0x410   :  { %v405_v6 = vmul.f32 %v2479_v31, %v404_v39 }
 0x412   :  { %1708 = vst.msk [vmem:[%s2606_s4 + $0x10] sm:$0xff] %vm96_vm0, %v405_v6  ;;  %1709 = vmatmul.msk.f32.vlgmr.msrb.gmra.mxu3 %vm96_vm0, %v405_v6 }
 0x413   :  { %957 = vmatpush.msrb.mxu3 %v2483_v36 }
 0x41a   :  { %1717 = vmatmul.msk.f32.vlgmr.msra.gmra.mxu3 %vm96_vm0, %v661_v43 }
 0x41b   :  { %1213 = vmatpush.msra.mxu3 %v2488_v48 }
 0x422   :  { %1725 = vmatmul.msk.f32.vlgmr.msrb.gmra.mxu3 %vm96_vm0, %v917_v54 }
 0x423   :  { %1469 = vmatpush.msrb.mxu3 %v1449_v12 }
 0x42a   :  { %1733 = vmatmul.msk.f32.vlgmr.msra.gmra.mxu3 %vm96_vm0, %v1173_v5 }
 0x43b   :  { %v1414_v31 = vpop.xlane.xlu1 %1413 }
 0x43c   :  { %1807 = vrcp.f32 %v1414_v31  ;;  %v1426_v8 = vand.u32 2147483648, %v1414_v31  ;;  %v1424_v20 = vand.u32 2147483647, %v1414_v31  ;;  %vm1420_vm1 = vweird.f32 %v1414_v31 }
 0x43e   :  { %v1427_v22 = vor.u32 1.1754944e-38, %v1426_v8  ;;  %vm1425_vm3 = vcmp.eq.f32.partialorder %v1424_v20, 8.507059e+37 }
 0x440   :  { %v1604_v1 = vpop.permute.xlu0 %1603 }
 0x441   :  { %v1646_v38 = vsel %vm96_vm0, %v2379_v19, %v1604_v1 }
 0x442   :  { %v1808_v13 = vpop.eup %1807 }
 0x443   :  { %v1416_v15 = vmul.f32 %v1808_v13, %v1414_v31  ;;  %vm1421_vm15 = vweird.f32 %v1808_v13 }
 0x444   :  { %vm1422_vm2 = vmor %vm1420_vm1, %vm1421_vm15 }
 0x445   :  { %v1417_v16 = vsub.f32 1.0, %v1416_v15 }
 0x447   :  { %v1418_v10 = vmul.f32 %v1808_v13, %v1417_v16 }
 0x448   :  { %v1612_v37 = vpop.permute.xlu0 %1611 }
 0x449   :  { %v1419_v36 = vadd.f32 %v1808_v13, %v1418_v10 }
 0x44b   :  { %v1423_v48 = vsel %vm1422_vm2, %v1808_v13, %v1419_v36 }
 0x44c   :  { %v1428_v24 = vsel %vm1425_vm3, %v1427_v22, %v1423_v48 }
 0x44d   :  { %v1429_v35 = vmul.f32 %v2490_v57, %v1428_v24 }
 0x44f   :  { %1740 = vst.msk [vmem:[%s2606_s4 + $0x50] sm:$0xff] %vm96_vm0, %v1429_v35  ;;  %1741 = vmatmul.msk.f32.vlgmr.msrb.gmra.mxu3 %vm96_vm0, %v1429_v35  ;;  %s1822_s4 = smov 16  }
 0x453   :  { %v1321_v25 = vpop.permute.xlu1 %1320 }
 0x454   :  { %1341 = vmatpush.msra.mxu2 %v1321_v25 }
 0x455   :  { %1737 = vmatmul.msk.f32.vlgmr.msra.gmra.mxu2 %vm96_vm0, %v2503_v14 }
 0x457   :  { %v1577_v28 = vpop.permute.xlu2 %1576 }
 0x458   :  { %1597 = vmatpush.msrb.mxu2 %v1577_v28  ;;  %v831_v29 = vpop.f32.mrf.mxu2 }
 0x459   :  { %1619 = vrot.lane.b32.xlu1 %v831_v29, %s1819_s17 }
 0x45d   :  { %1745 = vmatmul.msk.f32.vlgmr.msrb.gmra.mxu2 %vm96_vm0, %v2515_v44  ;;  %vm1663_vm0 = vcmask 654336  }
 0x460   :  { %v1087_v57 = vpop.f32.mrf.mxu2 }
 0x461   :  { %1627 = vrot.lane.b32.xlu2 %v1087_v57, %s1817_s15 }
 0x495   :  { %v447_v30 = vpop.f32.mrf.mxu3 }
 0x496   :  { %1607 = vrot.lane.b32.xlu2 %v447_v30, %s1822_s4 }
 0x49d   :  { %v703_v4 = vpop.f32.mrf.mxu3 }
 0x49e   :  { %1615 = vrot.lane.b32.xlu2 %v703_v4, %s1823_s22 }
 0x4a5   :  { %v959_v59 = vpop.f32.mrf.mxu3 }
 0x4a6   :  { %1623 = vrot.lane.b32.xlu0 %v959_v59, %s1818_s16 }
 0x4ad   :  { %v1215_v14 = vpop.f32.mrf.mxu3 }
 0x4ae   :  { %1631 = vrot.lane.b32.xlu1 %v1215_v14, %s1816_s14 }
 0x4bb   :  { %v1628_v56 = vpop.permute.xlu2 %1627 }
 0x4cb   :  { %v1620_v40 = vpop.permute.xlu1 %1619 }
 0x4d2   :  { %v1471_v17 = vpop.f32.mrf.mxu3 }
 0x4d3   :  { %1639 = vrot.lane.b32.xlu2 %v1471_v17, %s1814_s12 }
 0x4d8   :  { %v1343_v32 = vpop.f32.mrf.mxu2 }
 0x4d9   :  { %1635 = vrot.lane.b32.xlu0 %v1343_v32, %s1815_s13 }
 0x4e0   :  { %v1599_v18 = vpop.f32.mrf.mxu2 }
 0x4e1   :  { %1643 = vrot.lane.b32.xlu1 %v1599_v18, %s1813_s11 }
 0x4f0   :  { %v1608_v33 = vpop.permute.xlu2 %1607 }
 0x4f1   :  { %v1648_v41 = vsel %vm1647_vm4, %v1646_v38, %v1608_v33 }
 0x4f2   :  { %v1650_v44 = vsel %vm1649_vm5, %v1648_v41, %v1612_v37 }
 0x4f8   :  { %v1616_v42 = vpop.permute.xlu2 %1615 }
 0x4f9   :  { %v1652_v45 = vsel %vm1651_vm6, %v1650_v44, %v1616_v42 }
 0x4fa   :  { %v1654_v46 = vsel %vm1653_vm7, %v1652_v45, %v1620_v40 }
 0x518   :  { %v1624_v43 = vpop.permute.xlu0 %1623 }
 0x519   :  { %v1656_v21 = vsel %vm1655_vm8, %v1654_v46, %v1624_v43 }
 0x51a   :  { %v1658_v49 = vsel %vm1657_vm9, %v1656_v21, %v1628_v56 }
 0x520   :  { %v1632_v23 = vpop.permute.xlu1 %1631 }
 0x521   :  { %v1660_v50 = vsel %vm1659_vm10, %v1658_v49, %v1632_v23 }
 0x52d   :  { %v1640_v53 = vpop.permute.xlu2 %1639 }
 0x54b   :  { %v1636_v47 = vpop.permute.xlu0 %1635 }
 0x54c   :  { %v1662_v19 = vsel %vm1661_vm11, %v1660_v50, %v1636_v47 }
 0x54d   :  { %v1664_v55 = vsel %vm1663_vm0, %v1662_v19, %v1640_v53 }
 0x553   :  { %v1644_v54 = vpop.permute.xlu1 %1643 }
 0x554   :  { %v1666_v58 = vsel %vm1665_vm12, %v1664_v55, %v1644_v54 }
 0x555   :  { %v1668_v51 = vrot.slane %v1666_v58, 1  ;;  %v1669_v60 = vrot.slane %v1666_v58, 2  ;;  %v1670_v61 = vrot.slane %v1666_v58, 3  ;;  %1683 = vst.msk [vmem:[%s2607_s3] sm:$0x1] %vm1682_vm13, %v1666_v58  ;;  %v1671_v63 = vrot.slane %v1666_v58, 4 }
 0x556   :  { %v1672_v5 = vrot.slane %v1666_v58, 5  ;;  %v1673_v26 = vrot.slane %v1666_v58, 6  ;;  %v1674_v0 = vrot.slane %v1666_v58, 7 }
 0x557   :  { %1684 = vst.msk [vmem:[%s2607_s3 + $0x1] sm:$0x1] %vm1682_vm13, %v1668_v51 }
 0x558   :  { %1685 = vst.msk [vmem:[%s2607_s3 + $0x2] sm:$0x1] %vm1682_vm13, %v1669_v60 }
 0x559   :  { %1686 = vst.msk [vmem:[%s2607_s3 + $0x3] sm:$0x1] %vm1682_vm13, %v1670_v61 }
 0x55a   :  { %1687 = vst.msk [vmem:[%s2607_s3 + $0x4] sm:$0x1] %vm1682_vm13, %v1671_v63 }
 0x55b   :  { %1688 = vst.msk [vmem:[%s2607_s3 + $0x5] sm:$0x1] %vm1682_vm13, %v1672_v5 }
 0x55c   :  { %1689 = vst.msk [vmem:[%s2607_s3 + $0x6] sm:$0x1] %vm1682_vm13, %v1673_v26 }
 0x55d   :  { %1690 = vst.msk [vmem:[%s2607_s3 + $0x7] sm:$0x1] %vm1682_vm13, %v1674_v0 }

</bundles_post_ra>
